<compile_context>
chip_gen: v7x
topology: tpu7x:2x2x1
jax: 0.10.0
libtpu: 0.0.40
codegen_flags: <defaults>
</compile_context>

<pallas_src>
import functools

import jax
import jax.numpy as jnp
from jax import lax
from jax.experimental import pallas as pl
from jax.experimental.pallas import tpu as pltpu

# ---- hyper-params (n_embd from the spec; head_size = n_embd / 6; T <= block_size) ----
N_EMBD = 384          # C
HEAD_SIZE = 64        # hs
SEQ_LEN = 64          # T  (<= block_size = 256)
BATCH = 2             # B
NEG_BIG = -1e30       # finite additive causal-mask bias
LANE = 128            # TPU lane width


def head_kernel(x_ref, wqkv_ref, bias_ref, o_ref, *,
                batch_block, seq_len, head_size, hs_pad):
    """One grid step = `batch_block` batch rows.

    x_ref:    (batch_block*T, C) f32   -- batch rows stacked along sublanes
    wqkv_ref: (C, 3*hs_pad)      bf16  -- [Wq*hs^-0.5 | pad | Wk | pad | Wv | pad]
    bias_ref: (T, T)             f32   -- additive causal mask (0 / -1e30)
    o_ref:    (batch_block, T, hs)
    """
    T, hs = seq_len, head_size
    x = x_ref[...].astype(jnp.bfloat16)                                   # (BB*T, C)

    # Fused, lane-dense QKV projection: one MXU op, f32 accumulation.
    qkv = jnp.dot(x, wqkv_ref[...], preferred_element_type=jnp.float32)   # (BB*T, 3*hs_pad)
    bias = bias_ref[...]                                                  # (T, T)

    # Static unroll over the (small) number of batch rows in this block.
    for b in range(batch_block):
        r0 = b * T
        # Each slice starts at a 128-lane boundary -> no cross-lane relayout.
        q = qkv[r0:r0 + T, 0:hs]                                          # (T, hs) scaled
        k = qkv[r0:r0 + T, hs_pad:hs_pad + hs]                            # (T, hs)
        v = qkv[r0:r0 + T, 2 * hs_pad:2 * hs_pad + hs]                    # (T, hs)

        # Scores (scale already folded into Wq) + causal additive bias.
        wei = lax.dot_general(q.astype(jnp.bfloat16), k.astype(jnp.bfloat16),
                              (((1,), (1,)), ((), ())),
                              preferred_element_type=jnp.float32) + bias  # (T, T)

        # Numerically-stable f32 softmax; reciprocal on the EUP slot.
        m = jnp.max(wei, axis=-1, keepdims=True)
        e = jnp.exp(wei - m)
        p = e * pl.reciprocal(jnp.sum(e, axis=-1, keepdims=True), approx=True)

        # TODO(synk): nn.Dropout(p=0.2) on attention weights is eval-mode identity here.

        out_b = jnp.dot(p.astype(jnp.bfloat16), v.astype(jnp.bfloat16),
                        preferred_element_type=jnp.float32)               # (T, hs)
        o_ref[b] = out_b.astype(o_ref.dtype)


def _default_batch_block(B):
    """v7x has 2 TensorCores/chip -> give each TC a batch slice; single-TC
    v5e/v6e prefer folding the whole batch into one invocation."""
    try:
        kind = jax.devices()[0].device_kind.lower()
        if "v7" in kind and B % 2 == 0:
            return B // 2
    except Exception:
        pass
    return B


def head_forward(x, wq, wk, wv, *, batch_block=None):
    """x: (B, T, C) f32.  wq/wk/wv: (C, hs) f32 (already transposed for x @ W)."""
    B, T, C = x.shape
    hs = wq.shape[1]
    if batch_block is None:
        batch_block = _default_batch_block(B)
    assert B % batch_block == 0
    num_blocks = B // batch_block

    # ---- one-time weight prep (outside the kernel) ----
    # Pad each of Q/K/V to a full 128-lane block so in-kernel slices are
    # lane-tile aligned; fold the hs^-0.5 score scale into the Q columns.
    hs_pad = max(LANE, ((hs + LANE - 1) // LANE) * LANE)
    wqkv = jnp.zeros((C, 3 * hs_pad), jnp.float32)
    wqkv = wqkv.at[:, 0:hs].set(wq * (hs ** -0.5))
    wqkv = wqkv.at[:, hs_pad:hs_pad + hs].set(wk)
    wqkv = wqkv.at[:, 2 * hs_pad:2 * hs_pad + hs].set(wv)
    wqkv = wqkv.astype(jnp.bfloat16)                                      # (C, 3*hs_pad)

    # Precomputed additive causal bias: 0 on/below diagonal, -1e30 above.
    tril = jnp.tril(jnp.ones((T, T), dtype=bool))
    bias = jnp.where(tril, 0.0, NEG_BIG).astype(jnp.float32)              # (T, T)

    # Fold batch into the sublane (row) dimension: (B, T, C) -> (B*T, C).
    x2d = x.reshape(B * T, C)

    kernel = functools.partial(head_kernel, batch_block=batch_block,
                               seq_len=T, head_size=hs, hs_pad=hs_pad)

    # Advisory cost estimate for the XLA scheduler.
    flops = int(2 * (B * T) * C * (3 * hs_pad) + 2 * B * (2 * T * T * hs))
    bytes_accessed = int(x2d.size * 4 + wqkv.size * 2 + bias.size * 4 + B * T * hs * 4)
    cost = pl.CostEstimate(flops=flops, transcendentals=int(B * T * T),
                           bytes_accessed=bytes_accessed)

    return pl.pallas_call(
        kernel,
        out_shape=jax.ShapeDtypeStruct((B, T, hs), x.dtype),
        grid_spec=pltpu.PrefetchScalarGridSpec(
            num_scalar_prefetch=0,
            grid=(num_blocks,),
            in_specs=[
                pl.BlockSpec((batch_block * T, C), lambda i: (i, 0)),     # x rows
                pl.BlockSpec((C, 3 * hs_pad), lambda i: (0, 0)),          # fused Wqkv
                pl.BlockSpec((T, T), lambda i: (0, 0)),                   # causal bias
            ],
            out_specs=pl.BlockSpec((batch_block, T, hs), lambda i: (i, 0, 0)),
        ),
        compiler_params=pltpu.CompilerParams(
            dimension_semantics=("parallel",)),   # batch blocks independent
        cost_estimate=cost,
    )(x2d, wqkv, bias)


def reference(x, wq, wk, wv):
    """Pure-JAX f32 reference mirroring PyTorch Head.forward (dropout = identity)."""
    T = x.shape[1]
    q = x @ wq
    k = x @ wk
    v = x @ wv
    wei = jnp.einsum('btd,bsd->bts', q, k) * (k.shape[-1] ** -0.5)
    mask = jnp.tril(jnp.ones((T, T), dtype=bool))
    wei = jnp.where(mask, wei, -jnp.inf)
    wei = jax.nn.softmax(wei, axis=-1)
    return jnp.einsum('bts,bsd->btd', wei, v)


if __name__ == "__main__":
    key = jax.random.PRNGKey(0)
    kx, kq, kk, kv = jax.random.split(key, 4)
    x = jax.random.normal(kx, (BATCH, SEQ_LEN, N_EMBD), dtype=jnp.float32)
    s = 0.02
    wq = (s * jax.random.normal(kq, (N_EMBD, HEAD_SIZE))).astype(jnp.float32)
    wk = (s * jax.random.normal(kk, (N_EMBD, HEAD_SIZE))).astype(jnp.float32)
    wv = (s * jax.random.normal(kv, (N_EMBD, HEAD_SIZE))).astype(jnp.float32)

    out = jax.block_until_ready(head_forward(x, wq, wk, wv))
    ref = jax.block_until_ready(reference(x, wq, wk, wv))

    assert out.shape == ref.shape == (BATCH, SEQ_LEN, HEAD_SIZE)
    # bf16 MXU operands (f32 accumulation) + approx reciprocal => ~1e-3-level error.
    assert jnp.allclose(out, ref, rtol=1e-2, atol=1e-2), \
        f"max abs diff {jnp.max(jnp.abs(out - ref))}"

    print("KERNEL_OK")
</pallas_src>

<mosaic_0001>
module attributes {stable_mosaic.version = 11 : i64} {
  func.func @head_kernel(%arg0: i32, %arg1: memref<128x384xf32, #tpu.memory_space<vmem>>, %arg2: memref<384x384xbf16, #tpu.memory_space<vmem>>, %arg3: memref<64x64xf32, #tpu.memory_space<vmem>>, %arg4: memref<2x64x64xf32, #tpu.memory_space<vmem>>) attributes {dimension_semantics = [#tpu.dimension_semantics<parallel>], iteration_bounds = array<i64: 1>, scalar_prefetch = 0 : i64, scratch_operands = 0 : i64, tpu.core_type = #tpu.core_type<tc>, window_params = [{transform_indices = @transform_0, window_bounds = array<i64: 128, 384>}, {pipeline_mode = #tpu.pipeline_mode<synchronous>, transform_indices = @transform_1, window_bounds = array<i64: 384, 384>}, {pipeline_mode = #tpu.pipeline_mode<synchronous>, transform_indices = @transform_2, window_bounds = array<i64: 64, 64>}, {transform_indices = @transform_3, window_bounds = array<i64: 2, 64, 64>}]} {
    %c0 = arith.constant 0 : index
    %c0_0 = arith.constant 0 : index
    %0 = vector.load %arg1[%c0, %c0_0] : memref<128x384xf32, #tpu.memory_space<vmem>>, vector<128x384xf32>
    %1 = arith.truncf %0 : vector<128x384xf32> to vector<128x384xbf16>
    %c0_1 = arith.constant 0 : index
    %c0_2 = arith.constant 0 : index
    %2 = vector.load %arg2[%c0_1, %c0_2] : memref<384x384xbf16, #tpu.memory_space<vmem>>, vector<384x384xbf16>
    %cst = arith.constant dense<0.000000e+00> : vector<128x384xf32>
    %3 = tpu.matmul %1, %2, %cst {dimension_numbers = #tpu.dot_dimension_numbers<[1], [0], [0], [1], [0, 0, 1, 1], [], []>} : vector<128x384xbf16>, vector<384x384xbf16>, vector<128x384xf32> -> vector<128x384xf32>
    %c0_3 = arith.constant 0 : index
    %c0_4 = arith.constant 0 : index
    %4 = vector.load %arg3[%c0_3, %c0_4] : memref<64x64xf32, #tpu.memory_space<vmem>>, vector<64x64xf32>
    %5 = vector.extract_strided_slice %3 {offsets = [0, 0], sizes = [64, 64], strides = [1, 1]} : vector<128x384xf32> to vector<64x64xf32>
    %6 = vector.extract_strided_slice %3 {offsets = [0, 128], sizes = [64, 64], strides = [1, 1]} : vector<128x384xf32> to vector<64x64xf32>
    %7 = vector.extract_strided_slice %3 {offsets = [0, 256], sizes = [64, 64], strides = [1, 1]} : vector<128x384xf32> to vector<64x64xf32>
    %8 = arith.truncf %5 : vector<64x64xf32> to vector<64x64xbf16>
    %9 = arith.truncf %6 : vector<64x64xf32> to vector<64x64xbf16>
    %cst_5 = arith.constant dense<0.000000e+00> : vector<64x64xf32>
    %10 = tpu.matmul %8, %9, %cst_5 {dimension_numbers = #tpu.dot_dimension_numbers<[1], [1], [0], [0], [0, 0, 1, 0], [], []>} : vector<64x64xbf16>, vector<64x64xbf16>, vector<64x64xf32> -> vector<64x64xf32>
    %11 = arith.addf %10, %4 : vector<64x64xf32>
    %cst_6 = arith.constant dense<0xFF800000> : vector<64xf32>
    %12 = vector.multi_reduction <maximumf>, %11, %cst_6 [1] : vector<64x64xf32> to vector<64xf32>
    %13 = vector.shape_cast %12 : vector<64xf32> to vector<64x1xf32>
    %14 = vector.broadcast %13 : vector<64x1xf32> to vector<64x64xf32>
    %15 = arith.subf %11, %14 : vector<64x64xf32>
    %16 = math.exp %15 : vector<64x64xf32>
    %cst_7 = arith.constant dense<0.000000e+00> : vector<64xf32>
    %17 = vector.multi_reduction <add>, %16, %cst_7 [1] : vector<64x64xf32> to vector<64xf32>
    %18 = vector.shape_cast %17 : vector<64xf32> to vector<64x1xf32>
    %19 = tpu.reciprocal %18 {approx = true} : vector<64x1xf32> -> vector<64x1xf32>
    %20 = vector.broadcast %19 : vector<64x1xf32> to vector<64x64xf32>
    %21 = arith.mulf %16, %20 : vector<64x64xf32>
    %22 = arith.truncf %21 : vector<64x64xf32> to vector<64x64xbf16>
    %23 = arith.truncf %7 : vector<64x64xf32> to vector<64x64xbf16>
    %cst_8 = arith.constant dense<0.000000e+00> : vector<64x64xf32>
    %24 = tpu.matmul %22, %23, %cst_8 {dimension_numbers = #tpu.dot_dimension_numbers<[1], [0], [0], [1], [0, 0, 1, 1], [], []>} : vector<64x64xbf16>, vector<64x64xbf16>, vector<64x64xf32> -> vector<64x64xf32>
    %c0_9 = arith.constant 0 : index
    %c0_10 = arith.constant 0 : index
    %c0_11 = arith.constant 0 : index
    %25 = vector.load %arg4[%c0_9, %c0_10, %c0_11] : memref<2x64x64xf32, #tpu.memory_space<vmem>>, vector<1x64x64xf32>
    %26 = vector.shape_cast %25 : vector<1x64x64xf32> to vector<64x64xf32>
    %27 = vector.shape_cast %24 : vector<64x64xf32> to vector<1x64x64xf32>
    tpu.vector_store %arg4[%c0_9, %c0_10, %c0_11], %27 {strides = array<i32>} : memref<2x64x64xf32, #tpu.memory_space<vmem>>, vector<1x64x64xf32>,
    %28 = vector.extract_strided_slice %3 {offsets = [64, 0], sizes = [64, 64], strides = [1, 1]} : vector<128x384xf32> to vector<64x64xf32>
    %29 = vector.extract_strided_slice %3 {offsets = [64, 128], sizes = [64, 64], strides = [1, 1]} : vector<128x384xf32> to vector<64x64xf32>
    %30 = vector.extract_strided_slice %3 {offsets = [64, 256], sizes = [64, 64], strides = [1, 1]} : vector<128x384xf32> to vector<64x64xf32>
    %31 = arith.truncf %28 : vector<64x64xf32> to vector<64x64xbf16>
    %32 = arith.truncf %29 : vector<64x64xf32> to vector<64x64xbf16>
    %cst_12 = arith.constant dense<0.000000e+00> : vector<64x64xf32>
    %33 = tpu.matmul %31, %32, %cst_12 {dimension_numbers = #tpu.dot_dimension_numbers<[1], [1], [0], [0], [0, 0, 1, 0], [], []>} : vector<64x64xbf16>, vector<64x64xbf16>, vector<64x64xf32> -> vector<64x64xf32>
    %34 = arith.addf %33, %4 : vector<64x64xf32>
    %cst_13 = arith.constant dense<0xFF800000> : vector<64xf32>
    %35 = vector.multi_reduction <maximumf>, %34, %cst_13 [1] : vector<64x64xf32> to vector<64xf32>
    %36 = vector.shape_cast %35 : vector<64xf32> to vector<64x1xf32>
    %37 = vector.broadcast %36 : vector<64x1xf32> to vector<64x64xf32>
    %38 = arith.subf %34, %37 : vector<64x64xf32>
    %39 = math.exp %38 : vector<64x64xf32>
    %cst_14 = arith.constant dense<0.000000e+00> : vector<64xf32>
    %40 = vector.multi_reduction <add>, %39, %cst_14 [1] : vector<64x64xf32> to vector<64xf32>
    %41 = vector.shape_cast %40 : vector<64xf32> to vector<64x1xf32>
    %42 = tpu.reciprocal %41 {approx = true} : vector<64x1xf32> -> vector<64x1xf32>
    %43 = vector.broadcast %42 : vector<64x1xf32> to vector<64x64xf32>
    %44 = arith.mulf %39, %43 : vector<64x64xf32>
    %45 = arith.truncf %44 : vector<64x64xf32> to vector<64x64xbf16>
    %46 = arith.truncf %30 : vector<64x64xf32> to vector<64x64xbf16>
    %cst_15 = arith.constant dense<0.000000e+00> : vector<64x64xf32>
    %47 = tpu.matmul %45, %46, %cst_15 {dimension_numbers = #tpu.dot_dimension_numbers<[1], [0], [0], [1], [0, 0, 1, 1], [], []>} : vector<64x64xbf16>, vector<64x64xbf16>, vector<64x64xf32> -> vector<64x64xf32>
    %c1 = arith.constant 1 : index
    %c0_16 = arith.constant 0 : index
    %c0_17 = arith.constant 0 : index
    %48 = vector.load %arg4[%c1, %c0_16, %c0_17] : memref<2x64x64xf32, #tpu.memory_space<vmem>>, vector<1x64x64xf32>
    %49 = vector.shape_cast %48 : vector<1x64x64xf32> to vector<64x64xf32>
    %50 = vector.shape_cast %47 : vector<64x64xf32> to vector<1x64x64xf32>
    tpu.vector_store %arg4[%c1, %c0_16, %c0_17], %50 {strides = array<i32>} : memref<2x64x64xf32, #tpu.memory_space<vmem>>, vector<1x64x64xf32>,
    return
  }
  func.func @transform_0(%arg0: i32) -> (i32, i32) {
    %c0_i32 = arith.constant 0 : i32
    %c0_i32_0 = arith.constant 0 : i32
    return %arg0, %c0_i32 : i32, i32
  }
  func.func @transform_1(%arg0: i32) -> (i32, i32) {
    %c0_i32 = arith.constant 0 : i32
    %c0_i32_0 = arith.constant 0 : i32
    %c0_i32_1 = arith.constant 0 : i32
    return %c0_i32, %c0_i32_0 : i32, i32
  }
  func.func @transform_2(%arg0: i32) -> (i32, i32) {
    %c0_i32 = arith.constant 0 : i32
    %c0_i32_0 = arith.constant 0 : i32
    %c0_i32_1 = arith.constant 0 : i32
    return %c0_i32, %c0_i32_0 : i32, i32
  }
  func.func @transform_3(%arg0: i32) -> (i32, i32, i32) {
    %c0_i32 = arith.constant 0 : i32
    %c0_i32_0 = arith.constant 0 : i32
    %c0_i32_1 = arith.constant 0 : i32
    return %arg0, %c0_i32, %c0_i32_0 : i32, i32, i32
  }
}

</mosaic_0001>

<bundles_post_ra>
// kernel: tpu_custom_call.1
= control target key start
LH: loop header
LB: loop body
LE: loop exit
PB: predicated region body
PF: predicated region fallthrough
CT: control target
= control target key end

     0   :  { %8 = vsyncpa [#allocation3], 0  ;;  %s2517_s0 = inlined_call_operand.hbm [shape: f32[128,384], index: 0, kind: input, shape index: {}]   ;;  %s2518_s1 = inlined_call_operand.hbm [shape: bf16[384,384], index: 1, kind: input, shape index: {}]   ;;  %s2519_s2 = inlined_call_operand.hbm [shape: f32[64,64], index: 2, kind: input, shape index: {}]   ;;  %s2520_s3 = inlined_call_operand.hbm [shape: f32[2,64,64], index: 3, kind: output, shape index: {}]  }
   0x1   :  { %9 = vsyncpa [#allocation6], 0 }
   0x2   :  { %10 = vsyncpa [#allocation4], 0  ;;  %s2222_s12 = smov [#allocation5]   ;;  %s2128_s16 = scalar_lea.hbm %s2518_s1, 9216 }
   0x3   :  { %s28_s13 = sshll.u32 %s2222_s12, 4  ;;  %p2129_p0 = scmp.ne.s32.totalorder %s2518_s1, %s2128_s16  ;;  %s29_s13 = int_to_ptr.vmem [resolvable:$true] %s28_s13 }
   0x4   :  { %p2132_p1 = scmp.lt.u32.totalorder %s2128_s16, %s2518_s1 }
   0x6   :  { %p2134_p2 = pnand %p2132_p1, %p2129_p0 }
   0x8   :  { %2137 = shalt.err (!%p2134_p2)
}
   0x9   :  { %s2138_s21 = scalar_lea.vmem %s29_s13, 9216  ;;  %p2143_p4 = scmp.lt.s32.totalorder %s29_s13, %s29_s13 }
   0xa   :  { %p2139_p3 = scmp.ne.s32.totalorder %s29_s13, %s2138_s21  ;;  %p2144_p5 = scmp.lt.s32.totalorder %s2138_s21, %s2138_s21 }
   0xc   :  { %p2145_p6 = por %p2144_p5, %p2143_p4 }
   0xe   :  { %p2146_p7 = pnand %p2145_p6, %p2139_p3 }
  0x10   :  { %2149 = shalt.err (!%p2146_p7)
}
  0x11   :  { %s2223_s22 = smov 192   ;;  %s2224_s23 = smov 12  }
  0x12   :  { %34 = dma.hbm_to_vmem [thread:$0]  %s2518_s1, 9216, %s29_s13, [#allocation6], %s2223_s22, %s2223_s22, %s2224_s23  }
  0x13   :  { %s2225_s26 = smov [#allocation2]   ;;  %s2150_s30 = scalar_lea.hbm %s2517_s0, 6144 }
  0x14   :  { %s16_s27 = sshll.u32 %s2225_s26, 4  ;;  %p2151_p8 = scmp.ne.s32.totalorder %s2517_s0, %s2150_s30  ;;  %s17_s27 = int_to_ptr.vmem [resolvable:$true] %s16_s27 }
  0x15   :  { %p2154_p9 = scmp.lt.u32.totalorder %s2150_s30, %s2517_s0 }
  0x17   :  { %p2156_p10 = pnand %p2154_p9, %p2151_p8 }
  0x19   :  { %2159 = shalt.err (!%p2156_p10)
}
  0x1a   :  { %s2160_s8 = scalar_lea.vmem %s17_s27, 6144  ;;  %p2165_p12 = scmp.lt.s32.totalorder %s17_s27, %s17_s27 }
  0x1b   :  { %p2161_p11 = scmp.ne.s32.totalorder %s17_s27, %s2160_s8  ;;  %p2166_p13 = scmp.lt.s32.totalorder %s2160_s8, %s2160_s8 }
  0x1d   :  { %p2167_p0 = por %p2166_p13, %p2165_p12 }
  0x1f   :  { %p2168_p1 = pnand %p2167_p0, %p2161_p11 }
  0x21   :  { %2171 = shalt.err (!%p2168_p1)
}
  0x22   :  { %s2226_s1 = smov 384   ;;  %s2227_s9 = smov 24  }
  0x23   :  { %22 = dma.hbm_to_vmem [thread:$0]  %s2517_s0, 6144, %s17_s27, [#allocation3], %s2226_s1, %s2226_s1, %s2227_s9  }
  0x24   :  { %s2228_s12 = smov [#allocation7]   ;;  %s2172_s16 = scalar_lea.hbm %s2519_s2, 1024 }
  0x25   :  { %s40_s13 = sshll.u32 %s2228_s12, 4  ;;  %p2173_p2 = scmp.ne.s32.totalorder %s2519_s2, %s2172_s16  ;;  %s41_s13 = int_to_ptr.vmem [resolvable:$true] %s40_s13 }
  0x26   :  { %p2176_p3 = scmp.lt.u32.totalorder %s2172_s16, %s2519_s2 }
  0x28   :  { %p2178_p4 = pnand %p2176_p3, %p2173_p2 }
  0x2a   :  { %2181 = shalt.err (!%p2178_p4)
}
  0x2b   :  { %s2182_s21 = scalar_lea.vmem %s41_s13, 1024  ;;  %p2187_p6 = scmp.lt.s32.totalorder %s41_s13, %s41_s13 }
  0x2c   :  { %p2183_p5 = scmp.ne.s32.totalorder %s41_s13, %s2182_s21  ;;  %p2188_p7 = scmp.lt.s32.totalorder %s2182_s21, %s2182_s21 }
  0x2e   :  { %p2189_p8 = por %p2188_p7, %p2187_p6 }
  0x30   :  { %p2190_p9 = pnand %p2189_p8, %p2183_p5 }
  0x32   :  { %2193 = shalt.err (!%p2190_p9)
}
  0x33   :  { %s2229_s0 = smov 128   ;;  %s2230_s22 = smov 8  }
  0x34   :  { %46 = dma.hbm_to_vmem [thread:$0]  %s2519_s2, 1024, %s41_s13, [#allocation6], %s2229_s0, %s2229_s0, %s2230_s22  }
  0x35   :  { %2216 = dma.done.wait [#allocation3], 6144  }
  0x36   :  { %2217 = vsyncadd [#allocation3], 4294961152 }
  0x37   :  { %2218 = dma.done.wait [#allocation6], 10240  }
  0x38   :  { %2219 = vsyncadd [#allocation6], 4294957056  ;;  %v1968_v0 = vld [vmem:[#allocation5 + $0x4] ss:$12 sps:$4 sm:$0xff]   ;;  %v1970_v1 = vld [vmem:[#allocation5] ss:$12 sps:$4 sm:$0xff]  }
  0x39   :  { %609 = vmatprep.subr.bf16.mxu0 %v1968_v0  ;;  %v1971_v2 = vld [vmem:[#allocation5 + $0x1c] ss:$12 sps:$4 sm:$0xff]   ;;  %v1973_v3 = vld [vmem:[#allocation5 + $0x18] ss:$12 sps:$4 sm:$0xff]   ;;  %v1974_v4 = vld [vmem:[#allocation5 + $0x34] ss:$12 sps:$4 sm:$0xff]  }
  0x3a   :  { %610 = vmatpush1.bf16.msra.mxu0 %v1970_v1  ;;  %v1976_v5 = vld [vmem:[#allocation5 + $0x30] ss:$12 sps:$4 sm:$0xff]   ;;  %v1977_v6 = vld [vmem:[#allocation5 + $0x4c] ss:$12 sps:$4 sm:$0xff]   ;;  %v1979_v7 = vld [vmem:[#allocation5 + $0x48] ss:$12 sps:$4 sm:$0xff]  }
  0x3b   :  { %611 = vmatprep.subr.bf16.mxu0 %v1971_v2  ;;  %v1980_v8 = vld [vmem:[#allocation5 + $0x64] ss:$12 sps:$4 sm:$0xff]   ;;  %v1982_v9 = vld [vmem:[#allocation5 + $0x60] ss:$12 sps:$4 sm:$0xff]   ;;  %v1983_v10 = vld [vmem:[#allocation5 + $0x7c] ss:$12 sps:$4 sm:$0xff]  }
  0x3c   :  { %v1985_v11 = vld [vmem:[#allocation5 + $0x78] ss:$12 sps:$4 sm:$0xff]   ;;  %v1986_v12 = vld [vmem:[#allocation5 + $0x94] ss:$12 sps:$4 sm:$0xff]   ;;  %v1988_v13 = vld [vmem:[#allocation5 + $0x90] ss:$12 sps:$4 sm:$0xff]  }
  0x3d   :  { %v2016_v14 = vld [vmem:[#allocation5 + $0xc8] ss:$12 sps:$4 sm:$0xff]   ;;  %v61_v16 = vld [vmem:[#allocation2 + $0x20] sm:$0xff]  ;;  %v1989_v19 = vld [vmem:[#allocation5 + $0xac] ss:$12 sps:$4 sm:$0xff]   ;;  %vm1045_vm0 = vcmask 523264  }
  0x3e   :  { %612 = vmatpush1.bf16.msra.mxu0 %v1973_v3  ;;  %v58_v15 = vld [vmem:[#allocation2 + $0x8] sm:$0xff]  ;;  %1701 = vmatprep.subr.bf16.mxu1 %v2016_v14  ;;  %v1992_v21 = vld [vmem:[#allocation5 + $0xc4] ss:$12 sps:$4 sm:$0xff]   ;;  %v1998_v32 = vld [vmem:[#allocation5 + $0xf4] ss:$12 sps:$4 sm:$0xff]   ;;  %s2232_s2 = smov [#allocation8]  }
  0x3f   :  { %613 = vmatprep.subr.bf16.mxu0 %v1974_v4  ;;  %v106_v17 = vpack.c.bf16 %v61_v16, %v58_v15  ;;  %v2017_v18 = vld [vmem:[#allocation5 + $0x8] ss:$12 sps:$4 sm:$0xff]   ;;  %v2021_v22 = vld [vmem:[#allocation5 + $0xe0] ss:$12 sps:$4 sm:$0xff]   ;;  %v2023_v24 = vld [vmem:[#allocation5 + $0xf8] ss:$12 sps:$4 sm:$0xff]  }
  0x40   :  { %v1991_v20 = vld [vmem:[#allocation5 + $0xa8] ss:$12 sps:$4 sm:$0xff]   ;;  %1702 = vmatpush3.bf16.msra.mxu1 %v2017_v18  ;;  %v2022_v23 = vld [vmem:[#allocation5 + $0x20] ss:$12 sps:$4 sm:$0xff]   ;;  %v2024_v25 = vld [vmem:[#allocation5 + $0x38] ss:$12 sps:$4 sm:$0xff]  }
  0x41   :  { %641 = vmatprep.mubr.bf16.mxu0 %v106_v17  ;;  %867 = vmatprep.mubr.bf16.mxu1 %v106_v17  ;;  %v1994_v26 = vld [vmem:[#allocation5 + $0xc0] ss:$12 sps:$4 sm:$0xff]   ;;  %v1995_v27 = vld [vmem:[#allocation5 + $0xdc] ss:$12 sps:$4 sm:$0xff]   ;;  %v1997_v30 = vld [vmem:[#allocation5 + $0xd8] ss:$12 sps:$4 sm:$0xff]  }
  0x42   :  { %614 = vmatpush1.bf16.msra.mxu0 %v1976_v5  ;;  %1703 = vmatprep.subr.bf16.mxu1 %v2021_v22  ;;  %v2028_v28 = vld [vmem:[#allocation5 + $0x110] ss:$12 sps:$4 sm:$0xff]   ;;  %v2030_v31 = vld [vmem:[#allocation5 + $0x128] ss:$12 sps:$4 sm:$0xff]   ;;  %v2001_v35 = vld [vmem:[#allocation5 + $0x10c] ss:$12 sps:$4 sm:$0xff]  }
  0x43   :  { %615 = vmatprep.subr.bf16.mxu0 %v1977_v6  ;;  %v2029_v29 = vld [vmem:[#allocation5 + $0x50] ss:$12 sps:$4 sm:$0xff]   ;;  %v2031_v33 = vld [vmem:[#allocation5 + $0x68] ss:$12 sps:$4 sm:$0xff]   ;;  %v2035_v36 = vld [vmem:[#allocation5 + $0x140] ss:$12 sps:$4 sm:$0xff]  }
  0x44   :  { %1704 = vmatpush3.bf16.msra.mxu1 %v2022_v23  ;;  %v2000_v34 = vld [vmem:[#allocation5 + $0xf0] ss:$12 sps:$4 sm:$0xff]   ;;  %v2036_v37 = vld [vmem:[#allocation5 + $0x80] ss:$12 sps:$4 sm:$0xff]   ;;  %v2037_v38 = vld [vmem:[#allocation5 + $0x158] ss:$12 sps:$4 sm:$0xff]  }
  0x45   :  { %1705 = vmatprep.subr.bf16.mxu1 %v2023_v24  ;;  %v2003_v39 = vld [vmem:[#allocation5 + $0x108] ss:$12 sps:$4 sm:$0xff]   ;;  %v2004_v40 = vld [vmem:[#allocation5 + $0x124] ss:$12 sps:$4 sm:$0xff]   ;;  %v2006_v43 = vld [vmem:[#allocation5 + $0x120] ss:$12 sps:$4 sm:$0xff]  }
  0x46   :  { %616 = vmatpush1.bf16.msra.mxu0 %v1979_v7  ;;  %v2038_v41 = vld [vmem:[#allocation5 + $0x98] ss:$12 sps:$4 sm:$0xff]   ;;  %v2042_v42 = vld [vmem:[#allocation5 + $0x170] ss:$12 sps:$4 sm:$0xff]   ;;  %v2010_v47 = vld [vmem:[#allocation5 + $0x154] ss:$12 sps:$4 sm:$0xff]  }
  0x47   :  { %617 = vmatprep.subr.bf16.mxu0 %v1980_v8  ;;  %v2007_v44 = vld [vmem:[#allocation5 + $0x13c] ss:$12 sps:$4 sm:$0xff]   ;;  %v2009_v46 = vld [vmem:[#allocation5 + $0x138] ss:$12 sps:$4 sm:$0xff]   ;;  %v67_v51 = vld [vmem:[#allocation2 + $0x50] sm:$0xff]  ;;  %s1600_s25 = sshll.u32 %s2232_s2, 4  ;;  %s1601_s25 = int_to_ptr.vmem [resolvable:$true] %s1600_s25 }
  0x48   :  { %1706 = vmatpush3.bf16.msra.mxu1 %v2024_v25  ;;  %v2043_v45 = vld [vmem:[#allocation5 + $0xb0] ss:$12 sps:$4 sm:$0xff]   ;;  %v57_v48 = vld [vmem:[#allocation2] sm:$0xff]  ;;  %v2013_v55 = vld [vmem:[#allocation5 + $0x16c] ss:$12 sps:$4 sm:$0xff]   ;;  %s2194_s26 = scalar_lea.vmem %s1601_s25, 2048  ;;  %p2199_p11 = scmp.lt.s32.totalorder %s1601_s25, %s1601_s25 }
  0x49   :  { %1707 = vmatprep.subr.bf16.mxu1 %v2028_v28  ;;  %v60_v49 = vld [vmem:[#allocation2 + $0x18] sm:$0xff]  ;;  %v2015_v56 = vld [vmem:[#allocation5 + $0x168] ss:$12 sps:$4 sm:$0xff]   ;;  %v2020_v57 = vld [vmem:[#allocation5 + $0x184] ss:$12 sps:$4 sm:$0xff]   ;;  %p2195_p10 = scmp.ne.s32.totalorder %s1601_s25, %s2194_s26  ;;  %p2200_p12 = scmp.lt.s32.totalorder %s2194_s26, %s2194_s26 }
  0x4a   :  { %618 = vmatpush1.bf16.msra.mxu0 %v1982_v9  ;;  %v64_v50 = vld [vmem:[#allocation2 + $0x38] sm:$0xff]  ;;  %v105_v52 = vpack.c.bf16 %v60_v49, %v57_v48  ;;  %v63_v58 = vld [vmem:[#allocation2 + $0x30] sm:$0xff]  ;;  %v66_v59 = vld [vmem:[#allocation2 + $0x48] sm:$0xff] }
  0x4b   :  { %619 = vmatprep.subr.bf16.mxu0 %v1983_v10  ;;  %v2012_v53 = vld [vmem:[#allocation5 + $0x150] ss:$12 sps:$4 sm:$0xff]   ;;  %v109_v54 = vpack.c.bf16 %v67_v51, %v64_v50  ;;  %v70_v60 = vld [vmem:[#allocation2 + $0x68] sm:$0xff]  ;;  %v73_v62 = vld [vmem:[#allocation2 + $0x80] sm:$0xff]  ;;  %v108_v1 = vpack.c.bf16 %v66_v59, %v63_v58  ;;  %p2201_p13 = por %p2200_p12, %p2199_p11 }
  0x4c   :  { %1708 = vmatpush3.bf16.msra.mxu1 %v2029_v29  ;;  %v2056_v61 = vld [vmem:[#allocation5 + $0x188] ss:$12 sps:$4 sm:$0xff]   ;;  %v2057_v63 = vld [vmem:[#allocation5 + $0x1a0] ss:$12 sps:$4 sm:$0xff]   ;;  %v112_v3 = vpack.c.bf16 %v73_v62, %v70_v60  ;;  %v2058_v4 = vld [vmem:[#allocation5 + $0x1b8] ss:$12 sps:$4 sm:$0xff]  }
  0x4d   :  { %1709 = vmatprep.subr.bf16.mxu1 %v2030_v31  ;;  %v2018_v0 = vld [vmem:[#allocation5 + $0x180] ss:$12 sps:$4 sm:$0xff]   ;;  %v2027_v2 = vld [vmem:[#allocation5 + $0x19c] ss:$12 sps:$4 sm:$0xff]   ;;  %v2025_v5 = vld [vmem:[#allocation5 + $0x198] ss:$12 sps:$4 sm:$0xff]   ;;  %p2202_p0 = pnand %p2201_p13, %p2195_p10 }
  0x4e   :  { %620 = vmatpush1.bf16.msra.mxu0 %v1985_v11  ;;  %v69_v6 = vld [vmem:[#allocation2 + $0x60] sm:$0xff]  ;;  %v72_v7 = vld [vmem:[#allocation2 + $0x78] sm:$0xff]  ;;  %v79_v11 = vld [vmem:[#allocation2 + $0xb0] sm:$0xff] }
  0x4f   :  { %621 = vmatprep.subr.bf16.mxu0 %v1986_v12  ;;  %v2034_v8 = vld [vmem:[#allocation5 + $0x1b4] ss:$12 sps:$4 sm:$0xff]   ;;  %v76_v9 = vld [vmem:[#allocation2 + $0x98] sm:$0xff]  ;;  %v111_v12 = vpack.c.bf16 %v72_v7, %v69_v6  ;;  %v78_v18 = vld [vmem:[#allocation2 + $0xa8] sm:$0xff] }
  0x50   :  { %1710 = vmatpush3.bf16.msra.mxu1 %v2031_v33  ;;  %v2059_v10 = vld [vmem:[#allocation5 + $0x1d0] ss:$12 sps:$4 sm:$0xff]   ;;  %v115_v14 = vpack.c.bf16 %v79_v11, %v76_v9  ;;  %v2041_v15 = vld [vmem:[#allocation5 + $0x1cc] ss:$12 sps:$4 sm:$0xff]   ;;  %v2060_v16 = vld [vmem:[#allocation5 + $0x1e8] ss:$12 sps:$4 sm:$0xff]  }
  0x51   :  { %1711 = vmatprep.subr.bf16.mxu1 %v2035_v36  ;;  %v75_v17 = vld [vmem:[#allocation2 + $0x90] sm:$0xff]  ;;  %v85_v22 = vld [vmem:[#allocation2 + $0xe0] sm:$0xff]  ;;  %v88_v33 = vld [vmem:[#allocation2 + $0xf8] sm:$0xff] }
  0x52   :  { %622 = vmatpush1.bf16.msra.mxu0 %v1988_v13  ;;  %v2032_v13 = vld [vmem:[#allocation5 + $0x1b0] ss:$12 sps:$4 sm:$0xff]   ;;  %v114_v24 = vpack.c.bf16 %v78_v18, %v75_v17  ;;  %v2062_v28 = vld [vmem:[#allocation5 + $0x218] ss:$12 sps:$4 sm:$0xff]   ;;  %v74_v62 = vld [vmem:[#allocation2 + $0x88] sm:$0xff] }
  0x53   :  { %623 = vmatprep.subr.bf16.mxu0 %v1989_v19  ;;  %v2039_v19 = vld [vmem:[#allocation5 + $0x1c8] ss:$12 sps:$4 sm:$0xff]   ;;  %v2046_v23 = vld [vmem:[#allocation5 + $0x1e4] ss:$12 sps:$4 sm:$0xff]   ;;  %v96_v48 = vld [vmem:[#allocation2 + $0x138] sm:$0xff] }
  0x54   :  { %1712 = vmatpush3.bf16.msra.mxu1 %v2036_v37  ;;  %v81_v29 = vld [vmem:[#allocation2 + $0xc0] sm:$0xff]  ;;  %v100_v49 = vld [vmem:[#allocation2 + $0x158] sm:$0xff]  ;;  %v103_v50 = vld [vmem:[#allocation2 + $0x170] sm:$0xff] }
  0x55   :  { %1713 = vmatprep.subr.bf16.mxu1 %v2037_v38  ;;  %v2047_v31 = vld [vmem:[#allocation5 + $0x1f8] ss:$12 sps:$4 sm:$0xff]   ;;  %v2050_v38 = vld [vmem:[#allocation5 + $0x210] ss:$12 sps:$4 sm:$0xff]   ;;  %v98_v11 = vld [vmem:[#allocation2 + $0x148] sm:$0xff] }
  0x56   :  { %624 = vmatpush1.bf16.msra.mxu0 %v1991_v20  ;;  %v2061_v20 = vld [vmem:[#allocation5 + $0x200] ss:$12 sps:$4 sm:$0xff]   ;;  %v68_v60 = vld [vmem:[#allocation2 + $0x58] sm:$0xff] }
  0x57   :  { %625 = vmatprep.subr.bf16.mxu0 %v1992_v21  ;;  %v82_v21 = vld [vmem:[#allocation2 + $0xc8] sm:$0xff]  ;;  %v65_v59 = vld [vmem:[#allocation2 + $0x40] sm:$0xff]  ;;  %v92_v9 = vld [vmem:[#allocation2 + $0x118] sm:$0xff] }
  0x58   :  { %1714 = vmatpush3.bf16.msra.mxu1 %v2038_v41  ;;  %v118_v25 = vpack.c.bf16 %v85_v22, %v82_v21  ;;  %v90_v41 = vld [vmem:[#allocation2 + $0x108] sm:$0xff] }
  0x59   :  { %1715 = vmatprep.subr.bf16.mxu1 %v2042_v42  ;;  %v2053_v42 = vld [vmem:[#allocation5 + $0x228] ss:$12 sps:$4 sm:$0xff]  }
  0x5a   :  { %626 = vmatpush1.bf16.msra.mxu0 %v1994_v26  ;;  %v2044_v26 = vld [vmem:[#allocation5 + $0x1e0] ss:$12 sps:$4 sm:$0xff]  }
  0x5b   :  { %627 = vmatprep.subr.bf16.mxu0 %v1995_v27  ;;  %v2049_v27 = vld [vmem:[#allocation5 + $0x1fc] ss:$12 sps:$4 sm:$0xff]  }
  0x5c   :  { %1716 = vmatpush3.bf16.msra.mxu1 %v2043_v45 }
  0x5d   :  { %1813 = vmatprep.subr.bf16.mxu1 %v2056_v61 }
  0x5e   :  { %628 = vmatpush1.bf16.msra.mxu0 %v1997_v30  ;;  %v84_v30 = vld [vmem:[#allocation2 + $0xd8] sm:$0xff] }
  0x5f   :  { %629 = vmatprep.subr.bf16.mxu0 %v1998_v32  ;;  %868 = vmatmul.mubr.bf16.vlgmr.msra.gmra.mrb[0].mxu1 %v105_v52  ;;  %v2063_v32 = vld [vmem:[#allocation5 + $0x230] ss:$12 sps:$4 sm:$0xff]   ;;  %v117_v36 = vpack.c.bf16 %v84_v30, %v81_v29 }
  0x60   :  { %875 = vmatprep.mubr.bf16.mxu1 %v109_v54  ;;  %1814 = vmatpush3.bf16.msra.mxu1 %v2056_v61  ;;  %v71_v61 = vld [vmem:[#allocation2 + $0x70] sm:$0xff] }
  0x61   :  { %1815 = vmatprep.subr.bf16.mxu1 %v2057_v63 }
  0x62   :  { %630 = vmatpush1.bf16.msra.mxu0 %v2000_v34  ;;  %v91_v34 = vld [vmem:[#allocation2 + $0x110] sm:$0xff] }
  0x63   :  { %631 = vmatprep.subr.bf16.mxu0 %v2001_v35  ;;  %v2052_v35 = vld [vmem:[#allocation5 + $0x214] ss:$12 sps:$4 sm:$0xff]   ;;  %v121_v37 = vpack.c.bf16 %v91_v34, %v88_v33 }
  0x64   :  { %1816 = vmatpush3.bf16.msra.mxu1 %v2057_v63  ;;  %v110_v63 = vpack.c.bf16 %v68_v60, %v65_v59 }
  0x65   :  { %1817 = vmatprep.subr.bf16.mxu1 %v2058_v4 }
  0x66   :  { %632 = vmatpush1.bf16.msra.mxu0 %v2003_v39  ;;  %v2055_v39 = vld [vmem:[#allocation5 + $0x22c] ss:$12 sps:$4 sm:$0xff]  }
  0x67   :  { %633 = vmatprep.subr.bf16.mxu0 %v2004_v40  ;;  %876 = vmatmul.mubr.bf16.gmra.mrb[4].mxu1 %v108_v1  ;;  %v87_v40 = vld [vmem:[#allocation2 + $0xf0] sm:$0xff] }
  0x68   :  { %883 = vmatprep.mubr.bf16.mxu1 %v112_v3  ;;  %1818 = vmatpush3.bf16.msra.mxu1 %v2058_v4  ;;  %v120_v45 = vpack.c.bf16 %v90_v41, %v87_v40  ;;  %v83_v4 = vld [vmem:[#allocation2 + $0xd0] sm:$0xff] }
  0x69   :  { %1819 = vmatprep.subr.bf16.mxu1 %v2059_v10 }
  0x6a   :  { %634 = vmatpush1.bf16.msra.mxu0 %v2006_v43  ;;  %v94_v43 = vld [vmem:[#allocation2 + $0x128] sm:$0xff] }
  0x6b   :  { %635 = vmatprep.subr.bf16.mxu0 %v2007_v44  ;;  %v97_v44 = vld [vmem:[#allocation2 + $0x140] sm:$0xff] }
  0x6c   :  { %1820 = vmatpush3.bf16.msra.mxu1 %v2059_v10  ;;  %v95_v10 = vld [vmem:[#allocation2 + $0x130] sm:$0xff] }
  0x6d   :  { %1821 = vmatprep.subr.bf16.mxu1 %v2060_v16 }
  0x6e   :  { %636 = vmatpush1.bf16.msra.mxu0 %v2009_v46  ;;  %v124_v46 = vpack.c.bf16 %v97_v44, %v94_v43 }
  0x6f   :  { %637 = vmatprep.subr.bf16.mxu0 %v2010_v47  ;;  %884 = vmatmul.mubr.bf16.gmra.mrb[8].mxu1 %v111_v12  ;;  %v93_v47 = vld [vmem:[#allocation2 + $0x120] sm:$0xff] }
  0x70   :  { %891 = vmatprep.mubr.bf16.mxu1 %v115_v14  ;;  %1822 = vmatpush3.bf16.msra.mxu1 %v2060_v16  ;;  %v123_v51 = vpack.c.bf16 %v96_v48, %v93_v47 }
  0x71   :  { %1823 = vmatprep.subr.bf16.mxu1 %v2061_v20 }
  0x72   :  { %638 = vmatpush1.bf16.msra.mxu0 %v2012_v53  ;;  %v99_v53 = vld [vmem:[#allocation2 + $0x150] sm:$0xff] }
  0x73   :  { %639 = vmatprep.subr.bf16.mxu0 %v2013_v55  ;;  %v59_v55 = vld [vmem:[#allocation2 + $0x10] sm:$0xff] }
  0x74   :  { %1824 = vmatpush3.bf16.msra.mxu1 %v2061_v20 }
  0x75   :  { %1825 = vmatprep.subr.bf16.mxu1 %v2062_v28 }
  0x76   :  { %640 = vmatpush1.bf16.msra.mxu0 %v2015_v56  ;;  %v62_v56 = vld [vmem:[#allocation2 + $0x28] sm:$0xff] }
  0x77   :  { %722 = vmatprep.subr.bf16.mxu0 %v2020_v57  ;;  %892 = vmatmul.mubr.bf16.gmra.mrb[12].mxu1 %v114_v24  ;;  %v107_v58 = vpack.c.bf16 %v62_v56, %v59_v55 }
  0x78   :  { %899 = vmatprep.mubr.bf16.mxu1 %v118_v25  ;;  %1826 = vmatpush3.bf16.msra.mxu1 %v2062_v28 }
  0x79   :  { %642 = vmatmul.mubr.bf16.vlgmr.msra.gmra.mrb[0].mxu0 %v105_v52  ;;  %1827 = vmatprep.subr.bf16.mxu1 %v2063_v32  ;;  %v127_v52 = vpack.c.bf16 %v103_v50, %v100_v49 }
  0x7a   :  { %723 = vmatpush1.bf16.msra.mxu0 %v2018_v0  ;;  %651 = vmatprep.mubr.bf16.mxu0 %v109_v54  ;;  %v102_v54 = vld [vmem:[#allocation2 + $0x168] sm:$0xff]  ;;  %v113_v0 = vpack.c.bf16 %v74_v62, %v71_v61 }
  0x7b   :  { %724 = vmatprep.subr.bf16.mxu0 %v2027_v2  ;;  %v126_v57 = vpack.c.bf16 %v102_v54, %v99_v53  ;;  %v77_v2 = vld [vmem:[#allocation2 + $0xa0] sm:$0xff] }
  0x7c   :  { %1828 = vmatpush3.bf16.msra.mxu1 %v2063_v32 }
  0x7e   :  { %725 = vmatpush1.bf16.msra.mxu0 %v2025_v5  ;;  %v86_v5 = vld [vmem:[#allocation2 + $0xe8] sm:$0xff] }
  0x7f   :  { %726 = vmatprep.subr.bf16.mxu0 %v2034_v8  ;;  %900 = vmatmul.mubr.bf16.gmra.mrb[16].mxu1 %v117_v36  ;;  %v119_v7 = vpack.c.bf16 %v86_v5, %v83_v4  ;;  %v89_v8 = vld [vmem:[#allocation2 + $0x100] sm:$0xff] }
  0x80   :  { %907 = vmatprep.mubr.bf16.mxu1 %v121_v37 }
  0x81   :  { %652 = vmatmul.mubr.bf16.gmra.mrb[4].mxu0 %v108_v1  ;;  %v2231_v1 = vmov 0  }
  0x82   :  { %661 = vmatprep.mubr.bf16.mxu0 %v112_v3  ;;  %727 = vmatpush1.bf16.msra.mxu0 %v2032_v13  ;;  %v80_v3 = vld [vmem:[#allocation2 + $0xb8] sm:$0xff]  ;;  %v125_v13 = vpack.c.bf16 %v98_v11, %v95_v10 }
  0x83   :  { %728 = vmatprep.subr.bf16.mxu0 %v2041_v15  ;;  %v116_v6 = vpack.c.bf16 %v80_v3, %v77_v2  ;;  %v104_v15 = vld [vmem:[#allocation2 + $0x178] sm:$0xff] }
  0x86   :  { %729 = vmatpush1.bf16.msra.mxu0 %v2039_v19 }
  0x87   :  { %730 = vmatprep.subr.bf16.mxu0 %v2046_v23  ;;  %908 = vmatmul.mubr.bf16.gmra.mrb[20].mxu1 %v120_v45 }
  0x88   :  { %915 = vmatprep.mubr.bf16.mxu1 %v124_v46 }
  0x89   :  { %662 = vmatmul.mubr.bf16.gmra.mrb[8].mxu0 %v111_v12  ;;  %v122_v12 = vpack.c.bf16 %v92_v9, %v89_v8 }
  0x8a   :  { %671 = vmatprep.mubr.bf16.mxu0 %v115_v14  ;;  %731 = vmatpush1.bf16.msra.mxu0 %v2044_v26  ;;  %v101_v14 = vld [vmem:[#allocation2 + $0x160] sm:$0xff] }
  0x8b   :  { %732 = vmatprep.subr.bf16.mxu0 %v2049_v27  ;;  %v128_v16 = vpack.c.bf16 %v104_v15, %v101_v14 }
  0x8e   :  { %733 = vmatpush1.bf16.msra.mxu0 %v2047_v31 }
  0x8f   :  { %734 = vmatprep.subr.bf16.mxu0 %v2052_v35  ;;  %916 = vmatmul.mubr.bf16.gmra.mrb[24].mxu1 %v123_v51 }
  0x90   :  { %923 = vmatprep.mubr.bf16.mxu1 %v127_v52 }
  0x91   :  { %672 = vmatmul.mubr.bf16.gmra.mrb[12].mxu0 %v114_v24 }
  0x92   :  { %681 = vmatprep.mubr.bf16.mxu0 %v118_v25  ;;  %735 = vmatpush1.bf16.msra.mxu0 %v2050_v38 }
  0x93   :  { %736 = vmatprep.subr.bf16.mxu0 %v2055_v39 }
  0x96   :  { %737 = vmatpush1.bf16.msra.mxu0 %v2053_v42 }
  0x97   :  { %924 = vmatmul.mubr.bf16.gmra.mrb[28].mxu1 %v126_v57 }
  0x98   :  { %1829 = vmatprep.mubr.bf16.mxu1 %v107_v58 }
  0x99   :  { %682 = vmatmul.mubr.bf16.gmra.mrb[16].mxu0 %v117_v36 }
  0x9a   :  { %691 = vmatprep.mubr.bf16.mxu0 %v121_v37 }
  0x9f   :  { %1830 = vmatmul.mubr.bf16.vlgmr.msra.gmra.mrb[32].mxu1 %v110_v63 }
  0xa0   :  { %1833 = vmatprep.mubr.bf16.mxu1 %v113_v0 }
  0xa1   :  { %692 = vmatmul.mubr.bf16.gmra.mrb[20].mxu0 %v120_v45 }
  0xa2   :  { %701 = vmatprep.mubr.bf16.mxu0 %v124_v46 }
  0xa7   :  { %1834 = vmatmul.mubr.bf16.gmra.mrb[36].mxu1 %v116_v6 }
  0xa8   :  { %1837 = vmatprep.mubr.bf16.mxu1 %v119_v7 }
  0xa9   :  { %702 = vmatmul.mubr.bf16.gmra.mrb[24].mxu0 %v123_v51 }
  0xaa   :  { %711 = vmatprep.mubr.bf16.mxu0 %v127_v52 }
  0xaf   :  { %1838 = vmatmul.mubr.bf16.gmra.mrb[40].mxu1 %v122_v12 }
  0xb0   :  { %1841 = vmatprep.mubr.bf16.mxu1 %v125_v13 }
  0xb1   :  { %712 = vmatmul.mubr.bf16.gmra.mrb[28].mxu0 %v126_v57 }
  0xb2   :  { %754 = vmatprep.mubr.bf16.mxu0 %v2231_v1 }
  0xb7   :  { %1842 = vmatmul.mubr.bf16.gmra.mrb[44].mxu1 %v128_v16 }
  0xb9   :  { %755 = vmatmul.mubr.bf16.vlgmr.msra.gmra.mrb[0].mxu0 %v107_v58 }
  0xba   :  { %764 = vmatprep.mubr.bf16.mxu0 %v2231_v1 }
  0xc1   :  { %765 = vmatmul.mubr.bf16.gmra.mrb[4].mxu0 %v110_v63 }
  0xc2   :  { %774 = vmatprep.mubr.bf16.mxu0 %v2231_v1 }
  0xc9   :  { %775 = vmatmul.mubr.bf16.gmra.mrb[8].mxu0 %v113_v0 }
  0xca   :  { %784 = vmatprep.mubr.bf16.mxu0 %v2231_v1 }
  0xd1   :  { %785 = vmatmul.mubr.bf16.gmra.mrb[12].mxu0 %v116_v6 }
  0xd2   :  { %794 = vmatprep.mubr.bf16.mxu0 %v2231_v1 }
  0xd9   :  { %795 = vmatmul.mubr.bf16.gmra.mrb[16].mxu0 %v119_v7 }
  0xda   :  { %804 = vmatprep.mubr.bf16.mxu0 %v2231_v1 }
  0xe1   :  { %805 = vmatmul.mubr.bf16.gmra.mrb[20].mxu0 %v122_v12 }
  0xe2   :  { %814 = vmatprep.mubr.bf16.mxu0 %v2231_v1 }
  0xe9   :  { %815 = vmatmul.mubr.bf16.gmra.mrb[24].mxu0 %v125_v13 }
  0xea   :  { %824 = vmatprep.mubr.bf16.mxu0 %v2231_v1 }
  0xf1   :  { %825 = vmatmul.mubr.bf16.gmra.mrb[28].mxu0 %v128_v16 }
 0x132   :  { %v1717_v17 = vpop.f32.mrb[0].mxu1 }
 0x133   :  { %v1718_v18 = vpop.f32.mrb[1].mxu1 }
 0x134   :  { %v1719_v19 = vadd.f32 %v1718_v18, %v1717_v17  ;;  %v1720_v20 = vpop.f32.mrb[2].mxu1 }
 0x135   :  { %v1721_v21 = vpop.f32.mrb[3].mxu1 }
 0x136   :  { %v1722_v22 = vadd.f32 %v1721_v21, %v1720_v20 }
 0x13a   :  { %v1723_v23 = vpop.f32.mrb[4].mxu1 }
 0x13b   :  { %v1724_v24 = vpop.f32.mrb[5].mxu1 }
 0x13c   :  { %v1725_v25 = vadd.f32 %v1724_v24, %v1723_v23  ;;  %v1726_v26 = vpop.f32.mrb[6].mxu1 }
 0x13d   :  { %v1727_v27 = vpop.f32.mrb[7].mxu1 }
 0x13e   :  { %v1728_v28 = vadd.f32 %v1727_v27, %v1726_v26 }
 0x142   :  { %v1729_v29 = vpop.f32.mrb[8].mxu1 }
 0x143   :  { %v1730_v30 = vpop.f32.mrb[9].mxu1 }
 0x144   :  { %v1731_v31 = vadd.f32 %v1730_v30, %v1729_v29  ;;  %v1732_v32 = vpop.f32.mrb[10].mxu1 }
 0x145   :  { %v1733_v33 = vpop.f32.mrb[11].mxu1 }
 0x146   :  { %v1734_v34 = vadd.f32 %v1733_v33, %v1732_v32 }
 0x14a   :  { %v1735_v35 = vpop.f32.mrb[12].mxu1 }
 0x14b   :  { %v1736_v36 = vpop.f32.mrb[13].mxu1 }
 0x14c   :  { %v1737_v37 = vadd.f32 %v1736_v36, %v1735_v35  ;;  %v1738_v38 = vpop.f32.mrb[14].mxu1 }
 0x14d   :  { %v1739_v39 = vpop.f32.mrb[15].mxu1 }
 0x14e   :  { %v1740_v40 = vadd.f32 %v1739_v39, %v1738_v38 }
 0x152   :  { %v1741_v41 = vpop.f32.mrb[16].mxu1 }
 0x153   :  { %v1742_v42 = vpop.f32.mrb[17].mxu1 }
 0x154   :  { %v1743_v43 = vadd.f32 %v1742_v42, %v1741_v41  ;;  %v1744_v44 = vpop.f32.mrb[18].mxu1 }
 0x155   :  { %v1745_v45 = vpop.f32.mrb[19].mxu1 }
 0x156   :  { %v1746_v46 = vadd.f32 %v1745_v45, %v1744_v44 }
 0x15a   :  { %v1747_v47 = vpop.f32.mrb[20].mxu1 }
 0x15b   :  { %v1748_v48 = vpop.f32.mrb[21].mxu1 }
 0x15c   :  { %v1749_v49 = vadd.f32 %v1748_v48, %v1747_v47  ;;  %v1750_v50 = vpop.f32.mrb[22].mxu1 }
 0x15d   :  { %v1751_v51 = vpop.f32.mrb[23].mxu1 }
 0x15e   :  { %v1752_v52 = vadd.f32 %v1751_v51, %v1750_v50 }
 0x162   :  { %v1753_v53 = vpop.f32.mrb[24].mxu1 }
 0x163   :  { %v1754_v54 = vpop.f32.mrb[25].mxu1 }
 0x164   :  { %v2292_v55 = vadd.f32 %v1754_v54, %v1753_v53  ;;  %v1756_v56 = vpop.f32.mrb[26].mxu1 }
 0x165   :  { %v1757_v57 = vpop.f32.mrb[27].mxu1 }
 0x166   :  { %v2294_v58 = vadd.f32 %v1757_v57, %v1756_v56 }
 0x16a   :  { %v1759_v59 = vpop.f32.mrb[28].mxu1 }
 0x16b   :  { %v1760_v60 = vpop.f32.mrb[29].mxu1 }
 0x16c   :  { %v1761_v61 = vadd.f32 %v1760_v60, %v1759_v59  ;;  %v1762_v62 = vpop.f32.mrb[30].mxu1 }
 0x16d   :  { %v1763_v63 = vpop.f32.mrb[31].mxu1 }
 0x16e   :  { %v1764_v0 = vadd.f32 %v1763_v63, %v1762_v62 }
 0x172   :  { %v1831_v1 = vpop.f32.mrb[32].mxu1 }
 0x173   :  { %v975_v2 = vadd.f32 %v1831_v1, %v1725_v25  ;;  %v966_v3 = vpop.f32.mrb[33].mxu1 }
 0x174   :  { %v967_v4 = vadd.f32 %v1719_v19, %v966_v3  ;;  %v1832_v5 = vpop.f32.mrb[34].mxu1 }
 0x175   :  { %v978_v6 = vadd.f32 %v1832_v5, %v1728_v28  ;;  %v969_v7 = vpop.f32.mrb[35].mxu1 }
 0x176   :  { %v970_v8 = vadd.f32 %v1722_v22, %v969_v7 }
 0x177   :  { %v2296_v9 = vpack.c.bf16 %v978_v6, %v975_v2 }
 0x178   :  { %v2298_v10 = vpack.c.bf16 %v970_v8, %v967_v4 }
 0x17a   :  { %v1835_v11 = vpop.f32.mrb[36].mxu1 }
 0x17b   :  { %v991_v12 = vadd.f32 %v1835_v11, %v1737_v37  ;;  %v982_v13 = vpop.f32.mrb[37].mxu1 }
 0x17c   :  { %v983_v15 = vadd.f32 %v1731_v31, %v982_v13  ;;  %v1836_v16 = vpop.f32.mrb[38].mxu1 }
 0x17d   :  { %v994_v18 = vadd.f32 %v1836_v16, %v1740_v40  ;;  %v985_v20 = vpop.f32.mrb[39].mxu1 }
 0x17e   :  { %v986_v19 = vadd.f32 %v1734_v34, %v985_v20 }
 0x17f   :  { %v2300_v25 = vpack.c.bf16 %v994_v18, %v991_v12 }
 0x180   :  { %v2302_v26 = vpack.c.bf16 %v986_v19, %v983_v15 }
 0x182   :  { %v1839_v28 = vpop.f32.mrb[40].mxu1 }
 0x183   :  { %v1007_v29 = vadd.f32 %v1839_v28, %v1749_v49  ;;  %v998_v30 = vpop.f32.mrb[41].mxu1 }
 0x184   :  { %v999_v32 = vadd.f32 %v1743_v43, %v998_v30  ;;  %v1840_v33 = vpop.f32.mrb[42].mxu1  ;;  %v2376_v30 = vld [vmem:[#allocation7 + $0x10] sm:$0xff] }
 0x185   :  { %v1010_v35 = vadd.f32 %v1840_v33, %v1752_v52  ;;  %v1001_v36 = vpop.f32.mrb[43].mxu1 }
 0x186   :  { %v1002_v38 = vadd.f32 %v1746_v46, %v1001_v36 }
 0x187   :  { %v2307_v41 = vpack.c.bf16 %v1010_v35, %v1007_v29  ;;  %v2383_v35 = vld [vmem:[#allocation7 + $0x8] sm:$0xff] }
 0x188   :  { %v2309_v44 = vpack.c.bf16 %v1002_v38, %v999_v32  ;;  %v2380_v32 = vld [vmem:[#allocation7 + $0x18] sm:$0xff] }
 0x18a   :  { %1893 = vmatprep.subr.bf16.mxu0 %v2309_v44  ;;  %v1843_v43 = vpop.f32.mrb[44].mxu1 }
 0x18b   :  { %1894 = vmatpush3.bf16.msra.mxu0 %v2309_v44  ;;  %v1023_v47 = vadd.f32 %v1843_v43, %v1761_v61  ;;  %v1014_v48 = vpop.f32.mrb[45].mxu1 }
 0x18c   :  { %v756_v14 = vpop.f32.mrb[0].mxu0  ;;  %1895 = vmatprep.subr.bf16.mxu0 %v2307_v41  ;;  %v1015_v49 = vadd.f32 %v2292_v55, %v1014_v48  ;;  %v1844_v50 = vpop.f32.mrb[46].mxu1 }
 0x18d   :  { %v758_v17 = vpop.f32.mrb[1].mxu0  ;;  %v1026_v52 = vadd.f32 %v1844_v50, %v1764_v0  ;;  %v1017_v53 = vpop.f32.mrb[47].mxu1 }
 0x18e   :  { %v760_v21 = vpop.f32.mrb[2].mxu0  ;;  %v1018_v56 = vadd.f32 %v2294_v58, %v1017_v53 }
 0x18f   :  { %v1037_v23 = vpack.c.bf16 %v760_v21, %v756_v14  ;;  %v762_v24 = vpop.f32.mrb[3].mxu0  ;;  %1896 = vmatpush3.bf16.msra.mxu0 %v2307_v41  ;;  %v2319_v60 = vpack.c.bf16 %v1026_v52, %v1023_v47  ;;  %v2391_v47 = vld [vmem:[#allocation7 + $0x20] sm:$0xff] }
 0x190   :  { %v1041_v22 = vpack.c.bf16 %v762_v24, %v758_v17  ;;  %v2321_v62 = vpack.c.bf16 %v1018_v56, %v1015_v49  ;;  %v2394_v49 = vld [vmem:[#allocation7 + $0x30] sm:$0xff] }
 0x191   :  { %1853 = vmatprep.mubr.msk.bf16.mxu1 %vm1045_vm0, %v1037_v23 }
 0x192   :  { %v1059_v27 = vsel %vm1045_vm0, %v1041_v22, 0  ;;  %1949 = vmatprep.subr.msk.bf16.mxu1 %vm1045_vm0, %v1041_v22  ;;  %1897 = vmatprep.subr.bf16.mxu0 %v2321_v62 }
 0x193   :  { %1846 = vmatpush3.bf16.xpose.msra.mxu1 %v1059_v27  ;;  %1898 = vmatpush3.bf16.msra.mxu0 %v2321_v62 }
 0x194   :  { %v766_v31 = vpop.f32.mrb[4].mxu0  ;;  %1899 = vmatprep.subr.bf16.mxu0 %v2319_v60 }
 0x195   :  { %v768_v34 = vpop.f32.mrb[5].mxu0 }
 0x196   :  { %v770_v37 = vpop.f32.mrb[6].mxu0 }
 0x197   :  { %v1038_v39 = vpack.c.bf16 %v770_v37, %v766_v31  ;;  %v772_v40 = vpop.f32.mrb[7].mxu0  ;;  %1900 = vmatpush3.bf16.msra.mxu0 %v2319_v60  ;;  %v2378_v31 = vld [vmem:[#allocation7] sm:$0xff] }
 0x198   :  { %v1042_v42 = vpack.c.bf16 %v772_v40, %v768_v34 }
 0x19a   :  { %v1062_v45 = vsel %vm1045_vm0, %v1042_v42, 0  ;;  %1950 = vmatprep.subr.msk.bf16.mxu1 %vm1045_vm0, %v1042_v42 }
 0x19b   :  { %1848 = vmatpush3.bf16.xpose.msra.mxu1 %v1062_v45 }
 0x19c   :  { %v776_v46 = vpop.f32.mrb[8].mxu0 }
 0x19d   :  { %v778_v51 = vpop.f32.mrb[9].mxu0 }
 0x19e   :  { %v780_v54 = vpop.f32.mrb[10].mxu0 }
 0x19f   :  { %v1039_v57 = vpack.c.bf16 %v780_v54, %v776_v46  ;;  %v782_v59 = vpop.f32.mrb[11].mxu0  ;;  %v2399_v54 = vld [vmem:[#allocation7 + $0x38] sm:$0xff] }
 0x1a0   :  { %v1043_v61 = vpack.c.bf16 %v782_v59, %v778_v51  ;;  %v2396_v51 = vld [vmem:[#allocation7 + $0x28] sm:$0xff] }
 0x1a2   :  { %v1065_v63 = vsel %vm1045_vm0, %v1043_v61, 0  ;;  %1951 = vmatprep.subr.msk.bf16.mxu1 %vm1045_vm0, %v1043_v61 }
 0x1a3   :  { %1850 = vmatpush3.bf16.xpose.msra.mxu1 %v1065_v63 }
 0x1a4   :  { %v786_v55 = vpop.f32.mrb[12].mxu0 }
 0x1a5   :  { %v788_v58 = vpop.f32.mrb[13].mxu0 }
 0x1a6   :  { %v790_v0 = vpop.f32.mrb[14].mxu0 }
 0x1a7   :  { %v1040_v1 = vpack.c.bf16 %v790_v0, %v786_v55  ;;  %v792_v2 = vpop.f32.mrb[15].mxu0 }
 0x1a8   :  { %v1044_v3 = vpack.c.bf16 %v792_v2, %v788_v58 }
 0x1aa   :  { %v1068_v4 = vsel %vm1045_vm0, %v1044_v3, 0  ;;  %1952 = vmatprep.subr.msk.bf16.mxu1 %vm1045_vm0, %v1044_v3 }
 0x1ab   :  { %1852 = vmatpush3.bf16.xpose.msra.mxu1 %v1068_v4 }
 0x1ac   :  { %v2331_v5 = vpop.f32.mrb[16].mxu0  ;;  %1861 = vmatprep.subr.bf16.mxu1 %v2298_v10 }
 0x1ad   :  { %v798_v6 = vpop.f32.mrb[17].mxu0 }
 0x1ae   :  { %v2334_v7 = vpop.f32.mrb[18].mxu0 }
 0x1af   :  { %v1316_v8 = vpack.c.bf16 %v2334_v7, %v2331_v5  ;;  %v802_v11 = vpop.f32.mrb[19].mxu0 }
 0x1b0   :  { %v2338_v12 = vpack.c.bf16 %v802_v11, %v798_v6 }
 0x1b2   :  { %1854 = vmatmul.mubr.msk.bf16.vlgmr.msra.gmra.mrb[48].mxu1 %vm1045_vm0, %v1038_v39 }
 0x1b3   :  { %1857 = vmatprep.mubr.msk.bf16.mxu1 %vm1045_vm0, %v1039_v57  ;;  %1862 = vmatpush3.bf16.msra.mxu1 %v2298_v10 }
 0x1b4   :  { %v2343_v13 = vpop.f32.mrb[20].mxu0  ;;  %1863 = vmatprep.subr.bf16.mxu1 %v2296_v9 }
 0x1b5   :  { %v808_v14 = vpop.f32.mrb[21].mxu0 }
 0x1b6   :  { %v2346_v15 = vpop.f32.mrb[22].mxu0 }
 0x1b7   :  { %v1317_v16 = vpack.c.bf16 %v2346_v15, %v2343_v13  ;;  %v812_v17 = vpop.f32.mrb[23].mxu0  ;;  %1864 = vmatpush3.bf16.msra.mxu1 %v2296_v9 }
 0x1b8   :  { %v2351_v18 = vpack.c.bf16 %v812_v17, %v808_v14  ;;  %1865 = vmatprep.subr.bf16.mxu1 %v2302_v26 }
 0x1ba   :  { %1858 = vmatmul.mubr.msk.bf16.gmra.mrb[52].mxu1 %vm1045_vm0, %v1040_v1 }
 0x1bb   :  { %1866 = vmatpush3.bf16.msra.mxu1 %v2302_v26 }
 0x1bc   :  { %v2356_v10 = vpop.f32.mrb[24].mxu0  ;;  %1867 = vmatprep.subr.bf16.mxu1 %v2300_v25 }
 0x1bd   :  { %v818_v20 = vpop.f32.mrb[25].mxu0 }
 0x1be   :  { %v2359_v21 = vpop.f32.mrb[26].mxu0 }
 0x1bf   :  { %v1318_v19 = vpack.c.bf16 %v2359_v21, %v2356_v10  ;;  %v822_v23 = vpop.f32.mrb[27].mxu0  ;;  %1868 = vmatpush3.bf16.msra.mxu1 %v2300_v25 }
 0x1c0   :  { %v2364_v9 = vpack.c.bf16 %v822_v23, %v818_v20  ;;  %1953 = vmatprep.subr.msk.bf16.mxu1 %vm1045_vm0, %v2338_v12 }
 0x1c4   :  { %v2368_v24 = vpop.f32.mrb[28].mxu0 }
 0x1c5   :  { %v828_v22 = vpop.f32.mrb[29].mxu0 }
 0x1c6   :  { %v2370_v26 = vpop.f32.mrb[30].mxu0 }
 0x1c7   :  { %v1319_v27 = vpack.c.bf16 %v2370_v26, %v2368_v24  ;;  %v832_v28 = vpop.f32.mrb[31].mxu0 }
 0x1c8   :  { %v2374_v29 = vpack.c.bf16 %v832_v28, %v828_v22 }
 0x285   :  { %v1855_v25 = vpop.f32.mrb[48].mxu1 }
 0x286   :  { %v1113_v33 = vadd.f32 %v1855_v25, %v2376_v30  ;;  %v1104_v34 = vpop.f32.mrb[49].mxu1 }
 0x287   :  { %v1105_v36 = vadd.f32 %v1104_v34, %v2378_v31  ;;  %v1856_v37 = vpop.f32.mrb[50].mxu1 }
 0x288   :  { %v1116_v38 = vadd.f32 %v1856_v37, %v2380_v32  ;;  %v1107_v39 = vpop.f32.mrb[51].mxu1  ;;  %v1141_v40 = vsel %vm1045_vm0, %v1113_v33, -inf }
 0x289   :  { %v1108_v42 = vadd.f32 %v1107_v39, %v2383_v35  ;;  %1142 = vmax.xlane.f32.xlu1 %v1141_v40  ;;  %v1135_v45 = vsel %vm1045_vm0, %v1105_v36, -inf }
 0x28a   :  { %1136 = vmax.xlane.f32.xlu0 %v1135_v45  ;;  %v1144_v43 = vsel %vm1045_vm0, %v1116_v38, -inf }
 0x28b   :  { %v1138_v46 = vsel %vm1045_vm0, %v1108_v42, -inf }
 0x28d   :  { %1145 = vmax.xlane.f32.xlu1 %v1144_v43  ;;  %v1859_v48 = vpop.f32.mrb[52].mxu1 }
 0x28e   :  { %v1120_v50 = vpop.f32.mrb[53].mxu1  ;;  %1139 = vmax.xlane.f32.xlu0 %v1138_v46  ;;  %v1129_v57 = vadd.f32 %v1859_v48, %v2394_v49 }
 0x28f   :  { %v1121_v52 = vadd.f32 %v1120_v50, %v2391_v47  ;;  %v1860_v53 = vpop.f32.mrb[54].mxu1 }
 0x290   :  { %v1123_v56 = vpop.f32.mrb[55].mxu1  ;;  %v1132_v63 = vadd.f32 %v1860_v53, %v2399_v54  ;;  %v1153_v58 = vsel %vm1045_vm0, %v1129_v57, -inf }
 0x291   :  { %v1124_v59 = vadd.f32 %v1123_v56, %v2396_v51  ;;  %v1147_v61 = vsel %vm1045_vm0, %v1121_v52, -inf }
 0x292   :  { %1148 = vmax.xlane.f32.xlu0 %v1147_v61  ;;  %v1156_v0 = vsel %vm1045_vm0, %v1132_v63, -inf }
 0x293   :  { %v1150_v55 = vsel %vm1045_vm0, %v1124_v59, -inf }
 0x294   :  { %1151 = vmax.xlane.f32.xlu1 %v1150_v55 }
 0x296   :  { %1154 = vmax.xlane.f32.xlu0 %v1153_v58 }
 0x298   :  { %1157 = vmax.xlane.f32.xlu1 %v1156_v0 }
 0x316   :  { %v1143_v1 = vpop.xlane.xlu1 %1142 }
 0x317   :  { %v1161_v2 = vsub.f32 %v1113_v33, %v1143_v1  ;;  %v1137_v3 = vpop.xlane.xlu0 %1136 }
 0x318   :  { %v1159_v4 = vsub.f32 %v1105_v36, %v1137_v3 }
 0x319   :  { %v1171_v6 = vmul.f32 1.442695, %v1161_v2 }
 0x31a   :  { %v1167_v11 = vmul.f32 1.442695, %v1159_v4  ;;  %v1146_v14 = vpop.xlane.xlu1 %1145 }
 0x31b   :  { %v1162_v17 = vsub.f32 %v1116_v38, %v1146_v14  ;;  %v1140_v20 = vpop.xlane.xlu0 %1139 }
 0x31c   :  { %2064 = vpow2.f32 %v1167_v11  ;;  %v1160_v23 = vsub.f32 %v1108_v42, %v1140_v20 }
 0x31d   :  { %2066 = vpow2.f32 %v1171_v6  ;;  %v1173_v22 = vmul.f32 1.442695, %v1162_v17 }
 0x31e   :  { %v1169_v28 = vmul.f32 1.442695, %v1160_v23 }
 0x31f   :  { %v1149_v25 = vpop.xlane.xlu0 %1148 }
 0x320   :  { %2068 = vpow2.f32 %v1169_v28  ;;  %v1163_v34 = vsub.f32 %v1121_v52, %v1149_v25 }
 0x321   :  { %v1152_v37 = vpop.xlane.xlu1 %1151  ;;  %2070 = vpow2.f32 %v1173_v22 }
 0x322   :  { %v1175_v39 = vmul.f32 1.442695, %v1163_v34  ;;  %v1164_v40 = vsub.f32 %v1124_v59, %v1152_v37 }
 0x323   :  { %v1155_v33 = vpop.xlane.xlu0 %1154 }
 0x324   :  { %2072 = vpow2.f32 %v1175_v39  ;;  %v1177_v36 = vmul.f32 1.442695, %v1164_v40  ;;  %v1165_v45 = vsub.f32 %v1129_v57, %v1155_v33 }
 0x325   :  { %v1158_v43 = vpop.xlane.xlu1 %1157 }
 0x326   :  { %v2065_v48 = vpop.eup %2064  ;;  %2074 = vpow2.f32 %v1177_v36  ;;  %v1179_v38 = vmul.f32 1.442695, %v1165_v45  ;;  %v1166_v46 = vsub.f32 %v1132_v63, %v1158_v43 }
 0x327   :  { %v1183_v42 = vsel %vm1045_vm0, %v2065_v48, 0.0  ;;  %v2067_v50 = vpop.eup %2066 }
 0x328   :  { %2076 = vpow2.f32 %v1179_v38  ;;  %v1181_v53 = vmul.f32 1.442695, %v1166_v46  ;;  %1184 = vadd.xlane.f32.xlu0 %v1183_v42  ;;  %v1189_v56 = vsel %vm1045_vm0, %v2067_v50, 0.0 }
 0x32a   :  { %v2069_v52 = vpop.eup %2068  ;;  %2078 = vpow2.f32 %v1181_v53  ;;  %v1337_v53 = vsel %vm1045_vm0, %v2338_v12, 0  ;;  %v1343_v12 = vsel %vm1045_vm0, %v2364_v9, 0 }
 0x32b   :  { %v1186_v59 = vsel %vm1045_vm0, %v2069_v52, 0.0  ;;  %v2071_v61 = vpop.eup %2070 }
 0x32c   :  { %1190 = vadd.xlane.f32.xlu0 %v1189_v56  ;;  %1187 = vadd.xlane.f32.xlu1 %v1186_v59  ;;  %v1192_v55 = vsel %vm1045_vm0, %v2071_v61, 0.0 }
 0x32e   :  { %v2073_v57 = vpop.eup %2072 }
 0x32f   :  { %v1195_v63 = vsel %vm1045_vm0, %v2073_v57, 0.0 }
 0x330   :  { %v2075_v58 = vpop.eup %2074  ;;  %1193 = vadd.xlane.f32.xlu1 %v1192_v55  ;;  %1196 = vadd.xlane.f32.xlu0 %v1195_v63 }
 0x331   :  { %v1198_v1 = vsel %vm1045_vm0, %v2075_v58, 0.0 }
 0x332   :  { %v2077_v0 = vpop.eup %2076 }
 0x333   :  { %v1201_v2 = vsel %vm1045_vm0, %v2077_v0, 0.0 }
 0x334   :  { %v2079_v3 = vpop.eup %2078  ;;  %1199 = vadd.xlane.f32.xlu1 %v1198_v1  ;;  %1202 = vadd.xlane.f32.xlu0 %v1201_v2  ;;  %v1340_v1 = vsel %vm1045_vm0, %v2351_v18, 0 }
 0x335   :  { %v1204_v4 = vsel %vm1045_vm0, %v2079_v3, 0.0 }
 0x338   :  { %1205 = vadd.xlane.f32.xlu1 %v1204_v4 }
 0x3b5   :  { %v1185_v6 = vpop.xlane.xlu0 %1184 }
 0x3b6   :  { %2080 = vrcp.f32 %v1185_v6 }
 0x3b9   :  { %v1188_v11 = vpop.xlane.xlu1 %1187  ;;  %v1191_v14 = vpop.xlane.xlu0 %1190 }
 0x3ba   :  { %2082 = vrcp.f32 %v1188_v11 }
 0x3bb   :  { %2084 = vrcp.f32 %v1191_v14 }
 0x3bd   :  { %v1194_v17 = vpop.xlane.xlu1 %1193  ;;  %v1197_v20 = vpop.xlane.xlu0 %1196 }
 0x3be   :  { %2086 = vrcp.f32 %v1194_v17 }
 0x3bf   :  { %2088 = vrcp.f32 %v1197_v20 }
 0x3c0   :  { %v2081_v28 = vpop.eup %2080 }
 0x3c1   :  { %v1200_v23 = vpop.xlane.xlu1 %1199  ;;  %v1203_v22 = vpop.xlane.xlu0 %1202  ;;  %v1215_v37 = vmul.f32 %v2081_v28, %v2065_v48 }
 0x3c2   :  { %2090 = vrcp.f32 %v1200_v23 }
 0x3c3   :  { %2092 = vrcp.f32 %v1203_v22 }
 0x3c4   :  { %v2083_v25 = vpop.eup %2082 }
 0x3c5   :  { %v1206_v34 = vpop.xlane.xlu1 %1205  ;;  %v1216_v39 = vmul.f32 %v2083_v25, %v2069_v52  ;;  %v2085_v40 = vpop.eup %2084 }
 0x3c6   :  { %2094 = vrcp.f32 %v1206_v34  ;;  %v1217_v45 = vmul.f32 %v2085_v40, %v2067_v50 }
 0x3c7   :  { %v1223_v33 = vpack.c.bf16 %v1216_v39, %v1215_v37 }
 0x3c8   :  { %v2087_v36 = vpop.eup %2086 }
 0x3c9   :  { %v1218_v43 = vmul.f32 %v2087_v36, %v2071_v61  ;;  %1869 = vmatprep.mubr.msk.bf16.mxu1 %vm1045_vm0, %v1223_v33  ;;  %v2089_v38 = vpop.eup %2088 }
 0x3ca   :  { %v1219_v56 = vmul.f32 %v2089_v38, %v2073_v57 }
 0x3cb   :  { %v1224_v46 = vpack.c.bf16 %v1218_v43, %v1217_v45 }
 0x3cc   :  { %v2091_v42 = vpop.eup %2090 }
 0x3cd   :  { %1870 = vmatmul.mubr.msk.bf16.vlgmr.msra.gmra.mrb[56].mxu1 %vm1045_vm0, %v1224_v46  ;;  %v1220_v59 = vmul.f32 %v2091_v42, %v2075_v58  ;;  %v2093_v48 = vpop.eup %2092 }
 0x3ce   :  { %1878 = vmatpush3.bf16.xpose.msra.mxu1 %v1337_v53  ;;  %v1221_v61 = vmul.f32 %v2093_v48, %v2077_v0 }
 0x3cf   :  { %1954 = vmatprep.subr.msk.bf16.mxu1 %vm1045_vm0, %v2351_v18  ;;  %v1225_v52 = vpack.c.bf16 %v1220_v59, %v1219_v56  ;;  %v1346_v18 = vsel %vm1045_vm0, %v2374_v29, 0 }
 0x3d0   :  { %v2095_v50 = vpop.eup %2094 }
 0x3d1   :  { %1873 = vmatprep.mubr.msk.bf16.mxu1 %vm1045_vm0, %v1225_v52  ;;  %v1222_v55 = vmul.f32 %v2095_v50, %v2079_v3 }
 0x3d3   :  { %v1226_v63 = vpack.c.bf16 %v1222_v55, %v1221_v61 }
 0x3d5   :  { %1874 = vmatmul.mubr.msk.bf16.gmra.mrb[60].mxu1 %vm1045_vm0, %v1226_v63 }
 0x3d6   :  { %1880 = vmatpush3.bf16.xpose.msra.mxu1 %v1340_v1  ;;  %1885 = vmatprep.mubr.msk.bf16.mxu1 %vm1045_vm0, %v1316_v8 }
 0x3d7   :  { %1955 = vmatprep.subr.msk.bf16.mxu1 %vm1045_vm0, %v2364_v9 }
 0x3de   :  { %1882 = vmatpush3.bf16.xpose.msra.mxu1 %v1343_v12 }
 0x3df   :  { %1956 = vmatprep.subr.msk.bf16.mxu1 %vm1045_vm0, %v2374_v29 }
 0x3e6   :  { %1884 = vmatpush3.bf16.xpose.msra.mxu1 %v1346_v18 }
 0x3e7   :  { %1909 = vmatprep.subr.bf16.mxu1 %v2309_v44 }
 0x3ed   :  { %1886 = vmatmul.mubr.msk.bf16.vlgmr.msra.gmra.mrb[64].mxu1 %vm1045_vm0, %v1317_v16 }
 0x3ee   :  { %1889 = vmatprep.mubr.msk.bf16.mxu1 %vm1045_vm0, %v1318_v19  ;;  %1913 = vmatpush3.bf16.msra.mxu1 %v2309_v44 }
 0x3ef   :  { %1910 = vmatprep.subr.bf16.mxu1 %v2307_v41 }
 0x3f2   :  { %1914 = vmatpush3.bf16.msra.mxu1 %v2307_v41 }
 0x3f3   :  { %1911 = vmatprep.subr.bf16.mxu1 %v2321_v62 }
 0x3f5   :  { %1890 = vmatmul.mubr.msk.bf16.gmra.mrb[68].mxu1 %vm1045_vm0, %v1319_v27 }
 0x3f6   :  { %1915 = vmatpush3.bf16.msra.mxu1 %v2321_v62 }
 0x3f7   :  { %1912 = vmatprep.subr.bf16.mxu1 %v2319_v60 }
 0x3fa   :  { %1916 = vmatpush3.bf16.msra.mxu1 %v2319_v60 }
 0x4a0   :  { %v1871_v5 = vpop.f32.mrb[56].mxu1 }
 0x4a1   :  { %1310 = vst.msk [vmem:[#allocation8 + $0x10] sm:$0xff] %vm1045_vm0, %v1871_v5  ;;  %v1277_v44 = vpop.f32.mrb[57].mxu1 }
 0x4a2   :  { %1308 = vst.msk [vmem:[#allocation8] sm:$0xff] %vm1045_vm0, %v1277_v44  ;;  %v1872_v41 = vpop.f32.mrb[58].mxu1 }
 0x4a3   :  { %1311 = vst.msk [vmem:[#allocation8 + $0x18] sm:$0xff] %vm1045_vm0, %v1872_v41  ;;  %v1280_v7 = vpop.f32.mrb[59].mxu1 }
 0x4a4   :  { %1309 = vst.msk [vmem:[#allocation8 + $0x8] sm:$0xff] %vm1045_vm0, %v1280_v7 }
 0x4a8   :  { %v1875_v8 = vpop.f32.mrb[60].mxu1 }
 0x4a9   :  { %1314 = vst.msk [vmem:[#allocation8 + $0x30] sm:$0xff] %vm1045_vm0, %v1875_v8  ;;  %v1293_v62 = vpop.f32.mrb[61].mxu1 }
 0x4aa   :  { %1312 = vst.msk [vmem:[#allocation8 + $0x20] sm:$0xff] %vm1045_vm0, %v1293_v62  ;;  %v1876_v13 = vpop.f32.mrb[62].mxu1 }
 0x4ab   :  { %1315 = vst.msk [vmem:[#allocation8 + $0x38] sm:$0xff] %vm1045_vm0, %v1876_v13  ;;  %v1296_v60 = vpop.f32.mrb[63].mxu1 }
 0x4ac   :  { %1313 = vst.msk [vmem:[#allocation8 + $0x28] sm:$0xff] %vm1045_vm0, %v1296_v60 }
 0x4c0   :  { %v1887_v15 = vpop.f32.mrb[64].mxu1 }
 0x4c1   :  { %v1391_v16 = vadd.f32 %v1887_v15, %v2376_v30  ;;  %v1382_v10 = vpop.f32.mrb[65].mxu1 }
 0x4c2   :  { %v1888_v21 = vpop.f32.mrb[66].mxu1  ;;  %v1383_v19 = vadd.f32 %v1382_v10, %v2378_v31 }
 0x4c3   :  { %v1394_v9 = vadd.f32 %v1888_v21, %v2380_v32  ;;  %v1385_v24 = vpop.f32.mrb[67].mxu1  ;;  %v1419_v26 = vsel %vm1045_vm0, %v1391_v16, -inf }
 0x4c4   :  { %1420 = vmax.xlane.f32.xlu0 %v1419_v26  ;;  %v1386_v27 = vadd.f32 %v1385_v24, %v2383_v35  ;;  %v1413_v57 = vsel %vm1045_vm0, %v1383_v19, -inf }
 0x4c5   :  { %v1422_v29 = vsel %vm1045_vm0, %v1394_v9, -inf }
 0x4c6   :  { %1423 = vmax.xlane.f32.xlu1 %v1422_v29  ;;  %v1416_v0 = vsel %vm1045_vm0, %v1386_v27, -inf }
 0x4c8   :  { %v1891_v58 = vpop.f32.mrb[68].mxu1  ;;  %1414 = vmax.xlane.f32.xlu0 %v1413_v57 }
 0x4c9   :  { %v1398_v30 = vpop.f32.mrb[69].mxu1  ;;  %v1407_v3 = vadd.f32 %v1891_v58, %v2394_v49 }
 0x4ca   :  { %v1399_v31 = vadd.f32 %v1398_v30, %v2391_v47  ;;  %v1892_v2 = vpop.f32.mrb[70].mxu1  ;;  %1417 = vmax.xlane.f32.xlu1 %v1416_v0 }
 0x4cb   :  { %v1401_v32 = vpop.f32.mrb[71].mxu1  ;;  %v1410_v6 = vadd.f32 %v1892_v2, %v2399_v54  ;;  %v1431_v14 = vsel %vm1045_vm0, %v1407_v3, -inf }
 0x4cc   :  { %v1402_v4 = vadd.f32 %v1401_v32, %v2396_v51  ;;  %v1425_v35 = vsel %vm1045_vm0, %v1399_v31, -inf }
 0x4cd   :  { %1426 = vmax.xlane.f32.xlu0 %v1425_v35  ;;  %v1434_v47 = vsel %vm1045_vm0, %v1410_v6, -inf }
 0x4ce   :  { %v1428_v11 = vsel %vm1045_vm0, %v1402_v4, -inf }
 0x4cf   :  { %1429 = vmax.xlane.f32.xlu1 %v1428_v11 }
 0x4d1   :  { %1432 = vmax.xlane.f32.xlu0 %v1431_v14 }
 0x4d3   :  { %1435 = vmax.xlane.f32.xlu1 %v1434_v47 }
 0x551   :  { %v1421_v17 = vpop.xlane.xlu0 %1420 }
 0x552   :  { %v1439_v20 = vsub.f32 %v1391_v16, %v1421_v17 }
 0x553   :  { %v1424_v23 = vpop.xlane.xlu1 %1423 }
 0x554   :  { %v1449_v49 = vmul.f32 1.442695, %v1439_v20  ;;  %v1440_v22 = vsub.f32 %v1394_v9, %v1424_v23 }
 0x555   :  { %v1415_v51 = vpop.xlane.xlu0 %1414 }
 0x556   :  { %2096 = vpow2.f32 %v1449_v49  ;;  %v1451_v28 = vmul.f32 1.442695, %v1440_v22  ;;  %v1437_v25 = vsub.f32 %v1383_v19, %v1415_v51 }
 0x557   :  { %v1418_v34 = vpop.xlane.xlu1 %1417 }
 0x558   :  { %2098 = vpow2.f32 %v1451_v28  ;;  %v1445_v54 = vmul.f32 1.442695, %v1437_v25  ;;  %v1438_v37 = vsub.f32 %v1386_v27, %v1418_v34 }
 0x55a   :  { %2100 = vpow2.f32 %v1445_v54  ;;  %v1447_v39 = vmul.f32 1.442695, %v1438_v37  ;;  %v1427_v40 = vpop.xlane.xlu0 %1426 }
 0x55b   :  { %v1441_v33 = vsub.f32 %v1399_v31, %v1427_v40 }
 0x55c   :  { %2102 = vpow2.f32 %v1447_v39  ;;  %v1430_v36 = vpop.xlane.xlu1 %1429 }
 0x55d   :  { %v1453_v45 = vmul.f32 1.442695, %v1441_v33  ;;  %v1442_v43 = vsub.f32 %v1402_v4, %v1430_v36 }
 0x55e   :  { %v1433_v38 = vpop.xlane.xlu0 %1432 }
 0x55f   :  { %2104 = vpow2.f32 %v1453_v45  ;;  %v1455_v46 = vmul.f32 1.442695, %v1442_v43  ;;  %v1443_v42 = vsub.f32 %v1407_v3, %v1433_v38 }
 0x560   :  { %v2097_v53 = vpop.eup %2096  ;;  %v1436_v56 = vpop.xlane.xlu1 %1435 }
 0x561   :  { %2106 = vpow2.f32 %v1455_v46  ;;  %v1457_v59 = vmul.f32 1.442695, %v1443_v42  ;;  %v1444_v48 = vsub.f32 %v1410_v6, %v1436_v56  ;;  %v1467_v52 = vsel %vm1045_vm0, %v2097_v53, 0.0 }
 0x562   :  { %v2099_v50 = vpop.eup %2098  ;;  %1468 = vadd.xlane.f32.xlu0 %v1467_v52 }
 0x563   :  { %2108 = vpow2.f32 %v1457_v59  ;;  %v1459_v61 = vmul.f32 1.442695, %v1444_v48  ;;  %v1470_v55 = vsel %vm1045_vm0, %v2099_v50, 0.0 }
 0x564   :  { %v2101_v63 = vpop.eup %2100  ;;  %1471 = vadd.xlane.f32.xlu1 %v1470_v55 }
 0x565   :  { %2110 = vpow2.f32 %v1459_v61  ;;  %v1461_v1 = vsel %vm1045_vm0, %v2101_v63, 0.0 }
 0x566   :  { %v2103_v12 = vpop.eup %2102  ;;  %1462 = vadd.xlane.f32.xlu0 %v1461_v1 }
 0x567   :  { %v1464_v18 = vsel %vm1045_vm0, %v2103_v12, 0.0 }
 0x568   :  { %1465 = vadd.xlane.f32.xlu1 %v1464_v18 }
 0x569   :  { %v2105_v5 = vpop.eup %2104 }
 0x56a   :  { %v1473_v44 = vsel %vm1045_vm0, %v2105_v5, 0.0 }
 0x56b   :  { %v2107_v41 = vpop.eup %2106  ;;  %1474 = vadd.xlane.f32.xlu0 %v1473_v44 }
 0x56c   :  { %v1476_v7 = vsel %vm1045_vm0, %v2107_v41, 0.0 }
 0x56d   :  { %v2109_v8 = vpop.eup %2108  ;;  %1477 = vadd.xlane.f32.xlu1 %v1476_v7 }
 0x56e   :  { %v1479_v62 = vsel %vm1045_vm0, %v2109_v8, 0.0 }
 0x56f   :  { %v2111_v13 = vpop.eup %2110  ;;  %1480 = vadd.xlane.f32.xlu0 %v1479_v62 }
 0x570   :  { %v1482_v60 = vsel %vm1045_vm0, %v2111_v13, 0.0 }
 0x571   :  { %1483 = vadd.xlane.f32.xlu1 %v1482_v60 }
 0x5ef   :  { %v1469_v15 = vpop.xlane.xlu0 %1468 }
 0x5f1   :  { %v1472_v16 = vpop.xlane.xlu1 %1471 }
 0x5f2   :  { %2112 = vrcp.f32 %v1472_v16 }
 0x5f3   :  { %v1463_v10 = vpop.xlane.xlu0 %1462 }
 0x5f4   :  { %2114 = vrcp.f32 %v1463_v10 }
 0x5f5   :  { %2116 = vrcp.f32 %v1469_v15  ;;  %v1466_v21 = vpop.xlane.xlu1 %1465 }
 0x5f6   :  { %2118 = vrcp.f32 %v1466_v21 }
 0x5f8   :  { %v1475_v19 = vpop.xlane.xlu0 %1474 }
 0x5f9   :  { %2120 = vrcp.f32 %v1475_v19 }
 0x5fa   :  { %v1478_v9 = vpop.xlane.xlu1 %1477 }
 0x5fb   :  { %2122 = vrcp.f32 %v1478_v9 }
 0x5fc   :  { %v1481_v24 = vpop.xlane.xlu0 %1480  ;;  %v2113_v26 = vpop.eup %2112 }
 0x5fd   :  { %2124 = vrcp.f32 %v1481_v24  ;;  %v1496_v30 = vmul.f32 %v2113_v26, %v2099_v50 }
 0x5fe   :  { %v2115_v27 = vpop.eup %2114  ;;  %v1484_v29 = vpop.xlane.xlu1 %1483 }
 0x5ff   :  { %v2117_v57 = vpop.eup %2116  ;;  %2126 = vrcp.f32 %v1484_v29  ;;  %v1493_v0 = vmul.f32 %v2115_v27, %v2101_v63 }
 0x600   :  { %v2119_v58 = vpop.eup %2118  ;;  %v1495_v2 = vmul.f32 %v2117_v57, %v2097_v53 }
 0x601   :  { %v1494_v31 = vmul.f32 %v2119_v58, %v2103_v12 }
 0x602   :  { %v1502_v4 = vpack.c.bf16 %v1496_v30, %v1495_v2 }
 0x603   :  { %v2121_v32 = vpop.eup %2120  ;;  %v1501_v3 = vpack.c.bf16 %v1494_v31, %v1493_v0 }
 0x604   :  { %v1497_v6 = vmul.f32 %v2121_v32, %v2105_v5 }
 0x605   :  { %v2123_v35 = vpop.eup %2122  ;;  %1901 = vmatprep.mubr.msk.bf16.mxu0 %vm1045_vm0, %v1501_v3 }
 0x606   :  { %1902 = vmatmul.mubr.msk.bf16.vlgmr.msra.gmra.mrb[32].mxu0 %vm1045_vm0, %v1502_v4  ;;  %v1498_v11 = vmul.f32 %v2123_v35, %v2107_v41 }
 0x607   :  { %v2125_v14 = vpop.eup %2124 }
 0x608   :  { %v1503_v47 = vpack.c.bf16 %v1498_v11, %v1497_v6  ;;  %v1499_v20 = vmul.f32 %v2125_v14, %v2109_v8 }
 0x609   :  { %v2127_v17 = vpop.eup %2126 }
 0x60a   :  { %v1500_v23 = vmul.f32 %v2127_v17, %v2111_v13  ;;  %1905 = vmatprep.mubr.msk.bf16.mxu1 %vm1045_vm0, %v1503_v47 }
 0x60c   :  { %v1504_v49 = vpack.c.bf16 %v1500_v23, %v1499_v20 }
 0x60e   :  { %1906 = vmatmul.mubr.msk.bf16.vlgmr.msra.gmra.mrb[72].mxu1 %vm1045_vm0, %v1504_v49 }
 0x6d9   :  { %v1903_v22 = vpop.f32.mrb[32].mxu0 }
 0x6da   :  { %1589 = vst.msk [vmem:[#allocation8 + $0x50] sm:$0xff] %vm1045_vm0, %v1903_v22  ;;  %v1555_v51 = vpop.f32.mrb[33].mxu0 }
 0x6db   :  { %1587 = vst.msk [vmem:[#allocation8 + $0x40] sm:$0xff] %vm1045_vm0, %v1555_v51  ;;  %v1904_v28 = vpop.f32.mrb[34].mxu0 }
 0x6dc   :  { %1590 = vst.msk [vmem:[#allocation8 + $0x58] sm:$0xff] %vm1045_vm0, %v1904_v28  ;;  %v1558_v25 = vpop.f32.mrb[35].mxu0 }
 0x6dd   :  { %1588 = vst.msk [vmem:[#allocation8 + $0x48] sm:$0xff] %vm1045_vm0, %v1558_v25 }
 0x6e1   :  { %v1907_v34 = vpop.f32.mrb[72].mxu1 }
 0x6e2   :  { %1593 = vst.msk [vmem:[#allocation8 + $0x70] sm:$0xff] %vm1045_vm0, %v1907_v34  ;;  %v1571_v54 = vpop.f32.mrb[73].mxu1 }
 0x6e3   :  { %1591 = vst.msk [vmem:[#allocation8 + $0x60] sm:$0xff] %vm1045_vm0, %v1571_v54  ;;  %v1908_v37 = vpop.f32.mrb[74].mxu1 }
 0x6e4   :  { %1594 = vst.msk [vmem:[#allocation8 + $0x78] sm:$0xff] %vm1045_vm0, %v1908_v37  ;;  %v1574_v39 = vpop.f32.mrb[75].mxu1 }
 0x6e5   :  { %1592 = vst.msk [vmem:[#allocation8 + $0x68] sm:$0xff] %vm1045_vm0, %v1574_v39 }
 0x6e6   :  { %2205 = shalt.err (!%p2202_p0)
}
 0x6e7   :  { %s2206_s29 = scalar_lea.hbm %s2520_s3, 2048 }
 0x6e8   :  { %p2207_p1 = scmp.ne.s32.totalorder %s2520_s3, %s2206_s29  ;;  %p2210_p2 = scmp.lt.u32.totalorder %s2206_s29, %s2520_s3 }
 0x6ea   :  { %p2212_p3 = pnand %p2210_p2, %p2207_p1 }
 0x6ec   :  { %2215 = shalt.err (!%p2212_p3)
}
 0x6ed   :  { %1606 = dma.vmem_to_hbm [thread:$0]  %s1601_s25, 2048, %s2520_s3, [#allocation4], %s2229_s0, %s2229_s0, %s2230_s22  }
 0x6ee   :  { %2220 = dma.done.wait [#allocation4], 2048  }
 0x6ef   :  { %2221 = vsyncadd [#allocation4], 4294965248 }
 0x6f0   :  { %1610 = vsyncpa [#allocation3], 1 }
 0x6f1   :  { %1611 = vsyncpa [#allocation6], 1 }
 0x6f2   :  { %1612 = vsyncpa [#allocation4], 1 }

</bundles_post_ra>
